<compile_context>
chip_gen: v7x
topology: tpu7x:2x2x1
jax: 0.10.0
libtpu: 0.0.40
codegen_flags: <defaults>
</compile_context>

<pallas_src>
import functools
from dataclasses import dataclass, field

import jax
import jax.numpy as jnp
from jax.experimental import pallas as pl
from jax.experimental.pallas import tpu as pltpu


@dataclass
class ModelConfig:
    state_size: int
    hidden_layer_sizes: list = field(default_factory=list)
    num_residual_blocks: int = 0
    residual_size: int = 0
    dropout: float = 0.0
    j_norm: float = 1.0


_F_PAD = 128          # lane-dense feature width for all layer outputs
_BN_EPS = 1e-5


def _round_up(x, m):
    return ((x + m - 1) // m) * m


# ---------------------------------------------------------------------------
# Fused forward kernel: whole network per batch tile, weights resident in VMEM
# ---------------------------------------------------------------------------
def _fused_forward_kernel(x_ref, w0_ref, ws_ref, b_ref, t_ref, hw_ref, hb_ref, o_ref,
                          *, n_pre, n_res, j_norm):
    """o = head( resblocks( hidden_mlp(x) ) ) * j_norm, all in one kernel.

    x_ref : (tb, S_pad) bf16 activations (batch-tiled).
    w0_ref: (S_pad, 128) bf16 first-layer weight (BN scale folded in).
    ws_ref: (L-1, 128, 128) bf16 stacked weights for the remaining layers.
    b_ref : (L, 1, 128) f32 folded biases; t_ref: (L, 1, 128) f32 BN shifts.
    hw_ref/hb_ref: head Linear(residual_size, 1) padded to (128, 128)/(1, 128).
    o_ref : (tb//128, 128) lane-dense output slab (column 0 of the head, transposed).
    Layer order: hidden layers first, then (first, second) per residual block.
    """

    def lin_act(h, w, li):
        # bf16 matmul on the MXU with f32 accumulation; bias/ReLU/shift in f32.
        y = jnp.dot(h.astype(jnp.bfloat16), w,
                    preferred_element_type=jnp.float32) + b_ref[li]
        return jnp.maximum(y, 0.0) + t_ref[li]

    # First layer uses the narrow (S_pad, 128) weight — no 128-wide input padding.
    h = lin_act(x_ref[...], w0_ref[...], 0)
    li = 1
    for _ in range(n_pre - 1):           # static unroll: tiny, fixed layer count
        h = lin_act(h, ws_ref[li - 1], li)
        li += 1
    for _ in range(n_res):
        skip = h                         # skip stays on-chip — never touches HBM
        h = lin_act(h, ws_ref[li - 1], li)
        li += 1
        h = lin_act(h, ws_ref[li - 1], li) + skip
        li += 1

    # Head: only column 0 is real.
    y = jnp.dot(h.astype(jnp.bfloat16), hw_ref[...],
                preferred_element_type=jnp.float32) + hb_ref[...]

    # Lane-dense writeback: per 128-row block, XLU-transpose and keep row 0
    # (= column 0 of y), producing a (tb//128, 128) slab instead of (tb, 128).
    nblk = y.shape[0] // 128
    rows = [y[i * 128:(i + 1) * 128, :].T[0:1, :] for i in range(nblk)]
    out = rows[0] if nblk == 1 else jnp.concatenate(rows, axis=0)
    o_ref[...] = (out * j_norm).astype(o_ref.dtype)


# ---------------------------------------------------------------------------
# Wrapper: batch-pad only, batch-tiled grid, weights resident across grid
# ---------------------------------------------------------------------------
def forward(cfg: ModelConfig, packed, x, *, tile_b=1024):
    B, S = x.shape
    F = _F_PAD
    S_pad = packed["s_pad"]
    L1 = packed["ws"].shape[0]
    L = packed["bs"].shape[0]

    # Output blocks are (tb//128, 128), so tb must be a multiple of 128.
    # Multi-tile runs use 1024-row-multiple tiles so the output block's sublane dim
    # stays a multiple of 8, and keep >=2 grid steps so v7x's 2nd TensorCore has work.
    B128 = _round_up(max(B, 128), 128)
    if B128 >= 2048:
        tb = max(1024, _round_up(min(tile_b, B128 // 2), 1024))
        B_pad = _round_up(B128, tb)
    else:
        tb = B128
        B_pad = B128

    # Only the batch dim is padded (feature stays at state_size); input is bf16
    # since the first matmul operand is bf16 anyway — halves input HBM traffic.
    x_pad = jnp.zeros((B_pad, S_pad), jnp.bfloat16).at[:B, :S].set(
        x.astype(jnp.bfloat16))

    kern = functools.partial(
        _fused_forward_kernel,
        n_pre=packed["n_pre"],
        n_res=packed["n_res"],
        j_norm=float(cfg.j_norm),
    )

    out_pad = pl.pallas_call(
        kern,
        out_shape=jax.ShapeDtypeStruct((B_pad // 128, F), jnp.float32),
        grid_spec=pltpu.PrefetchScalarGridSpec(
            num_scalar_prefetch=0,
            grid=(B_pad // tb,),
            in_specs=[
                pl.BlockSpec((tb, S_pad), lambda b: (b, 0)),       # activations: tiled
                pl.BlockSpec((S_pad, F), lambda b: (0, 0)),        # first-layer weight
                pl.BlockSpec((L1, F, F), lambda b: (0, 0, 0)),     # remaining weights
                pl.BlockSpec((L, 1, F), lambda b: (0, 0, 0)),      # folded biases
                pl.BlockSpec((L, 1, F), lambda b: (0, 0, 0)),      # BN shifts
                pl.BlockSpec((F, F), lambda b: (0, 0)),            # head weight
                pl.BlockSpec((1, F), lambda b: (0, 0)),            # head bias
            ],
            out_specs=pl.BlockSpec((tb // 128, F), lambda b: (b, 0)),
        ),
        compiler_params=pltpu.CompilerParams(
            dimension_semantics=("parallel",),   # shard batch tiles across TCs on v7x
        ),
    )(x_pad, packed["w0"], packed["ws"], packed["bs"], packed["sh"],
      packed["hw"], packed["hb"])

    # (B_pad//128, 128) lane-dense slab -> (B, 1)
    return out_pad.reshape(-1)[:B].reshape(B, 1)


# ---------------------------------------------------------------------------
# Parameter construction (deterministic, synthetic) + lane-dense packing
# ---------------------------------------------------------------------------
def _make_linear_bn(key, fan_in, fan_out):
    """Linear(fan_in, fan_out) + BatchNorm1d(fan_out), BN folded to scale/shift."""
    kw, kb, kg, kbe, km, kv = jax.random.split(key, 6)
    bound = 1.0 / jnp.sqrt(fan_in)
    w = jax.random.uniform(kw, (fan_in, fan_out), jnp.float32, -bound, bound)
    b = jax.random.uniform(kb, (1, fan_out), jnp.float32, -bound, bound)
    gamma = 1.0 + 0.05 * jax.random.normal(kg, (1, fan_out), jnp.float32)
    beta = 0.05 * jax.random.normal(kbe, (1, fan_out), jnp.float32)
    run_mean = 0.05 * jax.random.normal(km, (1, fan_out), jnp.float32)
    run_var = jnp.abs(1.0 + 0.05 * jax.random.normal(kv, (1, fan_out), jnp.float32))
    scale = gamma / jnp.sqrt(run_var + _BN_EPS)
    shift = beta - run_mean * scale
    return {"w": w, "b": b, "scale": scale, "shift": shift}


def build_params(cfg: ModelConfig, key):
    params = {"hidden": [], "res": []}
    dims = [cfg.state_size] + list(cfg.hidden_layer_sizes) + [cfg.residual_size]
    for i in range(len(dims) - 1):
        key, sub = jax.random.split(key)
        params["hidden"].append(_make_linear_bn(sub, dims[i], dims[i + 1]))
    for _ in range(cfg.num_residual_blocks):
        key, k1, k2 = jax.random.split(key, 3)
        params["res"].append(
            (_make_linear_bn(k1, cfg.residual_size, cfg.residual_size),
             _make_linear_bn(k2, cfg.residual_size, cfg.residual_size))
        )
    key, kw, kb = jax.random.split(key, 3)
    bound = 1.0 / jnp.sqrt(cfg.residual_size)
    params["head_w"] = jax.random.uniform(kw, (cfg.residual_size, 1), jnp.float32, -bound, bound)
    params["head_b"] = jax.random.uniform(kb, (1, 1), jnp.float32, -bound, bound)
    return params


def pack_params(cfg: ModelConfig, params):
    """Stack + zero-pad all layers to lane-dense slabs; weights in bf16.

    The BN scale is folded through the ReLU into the weight/bias columns
    (ReLU(z)*s == ReLU(z*s), valid because s > 0 for every feature).
    Zero-padded weight rows/cols, zero bias/shift padding guarantee the padded
    feature lanes stay exactly 0 through every layer (incl. residual adds).
    """
    layers = list(params["hidden"])
    for first, second in params["res"]:
        layers.append(first)
        layers.append(second)
    L, F = len(layers), _F_PAD
    S_pad = _round_up(cfg.state_size, 8)

    # TODO(synk): real checkpoints could have negative BN gamma; fall back to an
    #             explicit in-kernel scale multiply for those lanes instead of folding.
    for lyr in layers:
        assert bool(jnp.all(lyr["scale"] > 0)), "BN-scale fold requires scale > 0"

    d0_in, d0_out = layers[0]["w"].shape
    w0 = jnp.zeros((S_pad, F), jnp.float32)
    w0 = w0.at[:d0_in, :d0_out].set(layers[0]["w"] * layers[0]["scale"])

    L1 = max(L - 1, 1)
    ws = jnp.zeros((L1, F, F), jnp.float32)
    bs = jnp.zeros((L, 1, F), jnp.float32)
    sh = jnp.zeros((L, 1, F), jnp.float32)
    for i, lyr in enumerate(layers):
        din, dout = lyr["w"].shape
        if i > 0:
            ws = ws.at[i - 1, :din, :dout].set(lyr["w"] * lyr["scale"])
        bs = bs.at[i, :, :dout].set(lyr["b"] * lyr["scale"])
        sh = sh.at[i, :, :dout].set(lyr["shift"])

    hw = jnp.zeros((F, F), jnp.float32).at[:cfg.residual_size, :1].set(params["head_w"])
    hb = jnp.zeros((1, F), jnp.float32).at[:, :1].set(params["head_b"])

    return {
        "w0": w0.astype(jnp.bfloat16),
        "ws": ws.astype(jnp.bfloat16),
        "bs": bs,
        "sh": sh,
        "hw": hw.astype(jnp.bfloat16),
        "hb": hb,
        "n_pre": len(params["hidden"]),
        "n_res": len(params["res"]),
        "s_pad": S_pad,
    }


# ---------------------------------------------------------------------------
# Pure-JAX reference (unpadded) mirroring the kernel math (bf16 matmul, f32 acc)
# ---------------------------------------------------------------------------
def forward_reference(cfg: ModelConfig, params, x):
    def dot(h, w):
        return jnp.dot(h.astype(jnp.bfloat16), w.astype(jnp.bfloat16),
                       preferred_element_type=jnp.float32)

    def layer(h, lyr):
        w = lyr["w"] * lyr["scale"]      # same BN-scale fold as pack_params
        b = lyr["b"] * lyr["scale"]
        return jnp.maximum(dot(h, w) + b, 0.0) + lyr["shift"]

    h = x
    for lyr in params["hidden"]:
        h = layer(h, lyr)
    for first, second in params["res"]:
        skip = h
        h = layer(h, first)
        h = layer(h, second) + skip
    return (dot(h, params["head_w"]) + params["head_b"]) * cfg.j_norm


# ---------------------------------------------------------------------------
if __name__ == "__main__":
    cfg = ModelConfig(
        state_size=32,
        hidden_layer_sizes=[64, 48],
        num_residual_blocks=2,
        residual_size=64,
        dropout=0.1,   # inference-mode identity
        j_norm=10.0,
    )
    key = jax.random.PRNGKey(0)
    key, kp, kx = jax.random.split(key, 3)
    params = build_params(cfg, kp)
    packed = pack_params(cfg, params)

    batch = 8
    x = jax.random.normal(kx, (batch, cfg.state_size), jnp.float32)

    out = jax.block_until_ready(forward(cfg, packed, x))
    ref = jax.block_until_ready(forward_reference(cfg, params, x))

    assert out.shape == (batch, 1)
    assert bool(jnp.all(jnp.isfinite(out)))
    assert bool(jnp.allclose(out, ref, atol=1e-2, rtol=1e-2))
    print("KERNEL_OK")
</pallas_src>

<mosaic_0001>
module attributes {stable_mosaic.version = 11 : i64} {
  func.func @_fused_forward_kernel(%arg0: i32, %arg1: memref<128x32xbf16, #tpu.memory_space<vmem>>, %arg2: memref<32x128xbf16, #tpu.memory_space<vmem>>, %arg3: memref<6x128x128xbf16, #tpu.memory_space<vmem>>, %arg4: memref<7x1x128xf32, #tpu.memory_space<vmem>>, %arg5: memref<7x1x128xf32, #tpu.memory_space<vmem>>, %arg6: memref<128x128xbf16, #tpu.memory_space<vmem>>, %arg7: memref<1x128xf32, #tpu.memory_space<vmem>>, %arg8: memref<1x128xf32, #tpu.memory_space<vmem>>) attributes {dimension_semantics = [#tpu.dimension_semantics<parallel>], iteration_bounds = array<i64: 1>, scalar_prefetch = 0 : i64, scratch_operands = 0 : i64, tpu.core_type = #tpu.core_type<tc>, window_params = [{transform_indices = @transform_0, window_bounds = array<i64: 128, 32>}, {pipeline_mode = #tpu.pipeline_mode<synchronous>, transform_indices = @transform_1, window_bounds = array<i64: 32, 128>}, {pipeline_mode = #tpu.pipeline_mode<synchronous>, transform_indices = @transform_2, window_bounds = array<i64: 6, 128, 128>}, {pipeline_mode = #tpu.pipeline_mode<synchronous>, transform_indices = @transform_3, window_bounds = array<i64: 7, 1, 128>}, {pipeline_mode = #tpu.pipeline_mode<synchronous>, transform_indices = @transform_4, window_bounds = array<i64: 7, 1, 128>}, {pipeline_mode = #tpu.pipeline_mode<synchronous>, transform_indices = @transform_5, window_bounds = array<i64: 128, 128>}, {pipeline_mode = #tpu.pipeline_mode<synchronous>, transform_indices = @transform_6, window_bounds = array<i64: 1, 128>}, {transform_indices = @transform_7, window_bounds = array<i64: 1, 128>}]} {
    %c0 = arith.constant 0 : index
    %c0_0 = arith.constant 0 : index
    %0 = vector.load %arg1[%c0, %c0_0] : memref<128x32xbf16, #tpu.memory_space<vmem>>, vector<128x32xbf16>
    %c0_1 = arith.constant 0 : index
    %c0_2 = arith.constant 0 : index
    %1 = vector.load %arg2[%c0_1, %c0_2] : memref<32x128xbf16, #tpu.memory_space<vmem>>, vector<32x128xbf16>
    %cst = arith.constant dense<0.000000e+00> : vector<128x128xf32>
    %2 = tpu.matmul %0, %1, %cst {dimension_numbers = #tpu.dot_dimension_numbers<[1], [0], [0], [1], [0, 0, 1, 1], [], []>} : vector<128x32xbf16>, vector<32x128xbf16>, vector<128x128xf32> -> vector<128x128xf32>
    %c0_3 = arith.constant 0 : index
    %c0_4 = arith.constant 0 : index
    %c0_5 = arith.constant 0 : index
    %3 = vector.load %arg4[%c0_3, %c0_4, %c0_5] : memref<7x1x128xf32, #tpu.memory_space<vmem>>, vector<1x1x128xf32>
    %4 = vector.shape_cast %3 : vector<1x1x128xf32> to vector<1x128xf32>
    %5 = vector.broadcast %4 : vector<1x128xf32> to vector<128x128xf32>
    %6 = arith.addf %2, %5 : vector<128x128xf32>
    %cst_6 = arith.constant 0.000000e+00 : f32
    %7 = vector.broadcast %cst_6 : f32 to vector<128x128xf32>
    %8 = arith.maximumf %6, %7 : vector<128x128xf32>
    %c0_7 = arith.constant 0 : index
    %c0_8 = arith.constant 0 : index
    %c0_9 = arith.constant 0 : index
    %9 = vector.load %arg5[%c0_7, %c0_8, %c0_9] : memref<7x1x128xf32, #tpu.memory_space<vmem>>, vector<1x1x128xf32>
    %10 = vector.shape_cast %9 : vector<1x1x128xf32> to vector<1x128xf32>
    %11 = vector.broadcast %10 : vector<1x128xf32> to vector<128x128xf32>
    %12 = arith.addf %8, %11 : vector<128x128xf32>
    %c0_10 = arith.constant 0 : index
    %c0_11 = arith.constant 0 : index
    %c0_12 = arith.constant 0 : index
    %13 = vector.load %arg3[%c0_10, %c0_11, %c0_12] : memref<6x128x128xbf16, #tpu.memory_space<vmem>>, vector<1x128x128xbf16>
    %14 = vector.shape_cast %13 : vector<1x128x128xbf16> to vector<128x128xbf16>
    %15 = arith.truncf %12 : vector<128x128xf32> to vector<128x128xbf16>
    %cst_13 = arith.constant dense<0.000000e+00> : vector<128x128xf32>
    %16 = tpu.matmul %15, %14, %cst_13 {dimension_numbers = #tpu.dot_dimension_numbers<[1], [0], [0], [1], [0, 0, 1, 1], [], []>} : vector<128x128xbf16>, vector<128x128xbf16>, vector<128x128xf32> -> vector<128x128xf32>
    %c1 = arith.constant 1 : index
    %c0_14 = arith.constant 0 : index
    %c0_15 = arith.constant 0 : index
    %17 = vector.load %arg4[%c1, %c0_14, %c0_15] : memref<7x1x128xf32, #tpu.memory_space<vmem>>, vector<1x1x128xf32>
    %18 = vector.shape_cast %17 : vector<1x1x128xf32> to vector<1x128xf32>
    %19 = vector.broadcast %18 : vector<1x128xf32> to vector<128x128xf32>
    %20 = arith.addf %16, %19 : vector<128x128xf32>
    %cst_16 = arith.constant 0.000000e+00 : f32
    %21 = vector.broadcast %cst_16 : f32 to vector<128x128xf32>
    %22 = arith.maximumf %20, %21 : vector<128x128xf32>
    %c1_17 = arith.constant 1 : index
    %c0_18 = arith.constant 0 : index
    %c0_19 = arith.constant 0 : index
    %23 = vector.load %arg5[%c1_17, %c0_18, %c0_19] : memref<7x1x128xf32, #tpu.memory_space<vmem>>, vector<1x1x128xf32>
    %24 = vector.shape_cast %23 : vector<1x1x128xf32> to vector<1x128xf32>
    %25 = vector.broadcast %24 : vector<1x128xf32> to vector<128x128xf32>
    %26 = arith.addf %22, %25 : vector<128x128xf32>
    %c1_20 = arith.constant 1 : index
    %c0_21 = arith.constant 0 : index
    %c0_22 = arith.constant 0 : index
    %27 = vector.load %arg3[%c1_20, %c0_21, %c0_22] : memref<6x128x128xbf16, #tpu.memory_space<vmem>>, vector<1x128x128xbf16>
    %28 = vector.shape_cast %27 : vector<1x128x128xbf16> to vector<128x128xbf16>
    %29 = arith.truncf %26 : vector<128x128xf32> to vector<128x128xbf16>
    %cst_23 = arith.constant dense<0.000000e+00> : vector<128x128xf32>
    %30 = tpu.matmul %29, %28, %cst_23 {dimension_numbers = #tpu.dot_dimension_numbers<[1], [0], [0], [1], [0, 0, 1, 1], [], []>} : vector<128x128xbf16>, vector<128x128xbf16>, vector<128x128xf32> -> vector<128x128xf32>
    %c2 = arith.constant 2 : index
    %c0_24 = arith.constant 0 : index
    %c0_25 = arith.constant 0 : index
    %31 = vector.load %arg4[%c2, %c0_24, %c0_25] : memref<7x1x128xf32, #tpu.memory_space<vmem>>, vector<1x1x128xf32>
    %32 = vector.shape_cast %31 : vector<1x1x128xf32> to vector<1x128xf32>
    %33 = vector.broadcast %32 : vector<1x128xf32> to vector<128x128xf32>
    %34 = arith.addf %30, %33 : vector<128x128xf32>
    %cst_26 = arith.constant 0.000000e+00 : f32
    %35 = vector.broadcast %cst_26 : f32 to vector<128x128xf32>
    %36 = arith.maximumf %34, %35 : vector<128x128xf32>
    %c2_27 = arith.constant 2 : index
    %c0_28 = arith.constant 0 : index
    %c0_29 = arith.constant 0 : index
    %37 = vector.load %arg5[%c2_27, %c0_28, %c0_29] : memref<7x1x128xf32, #tpu.memory_space<vmem>>, vector<1x1x128xf32>
    %38 = vector.shape_cast %37 : vector<1x1x128xf32> to vector<1x128xf32>
    %39 = vector.broadcast %38 : vector<1x128xf32> to vector<128x128xf32>
    %40 = arith.addf %36, %39 : vector<128x128xf32>
    %c2_30 = arith.constant 2 : index
    %c0_31 = arith.constant 0 : index
    %c0_32 = arith.constant 0 : index
    %41 = vector.load %arg3[%c2_30, %c0_31, %c0_32] : memref<6x128x128xbf16, #tpu.memory_space<vmem>>, vector<1x128x128xbf16>
    %42 = vector.shape_cast %41 : vector<1x128x128xbf16> to vector<128x128xbf16>
    %43 = arith.truncf %40 : vector<128x128xf32> to vector<128x128xbf16>
    %cst_33 = arith.constant dense<0.000000e+00> : vector<128x128xf32>
    %44 = tpu.matmul %43, %42, %cst_33 {dimension_numbers = #tpu.dot_dimension_numbers<[1], [0], [0], [1], [0, 0, 1, 1], [], []>} : vector<128x128xbf16>, vector<128x128xbf16>, vector<128x128xf32> -> vector<128x128xf32>
    %c3 = arith.constant 3 : index
    %c0_34 = arith.constant 0 : index
    %c0_35 = arith.constant 0 : index
    %45 = vector.load %arg4[%c3, %c0_34, %c0_35] : memref<7x1x128xf32, #tpu.memory_space<vmem>>, vector<1x1x128xf32>
    %46 = vector.shape_cast %45 : vector<1x1x128xf32> to vector<1x128xf32>
    %47 = vector.broadcast %46 : vector<1x128xf32> to vector<128x128xf32>
    %48 = arith.addf %44, %47 : vector<128x128xf32>
    %cst_36 = arith.constant 0.000000e+00 : f32
    %49 = vector.broadcast %cst_36 : f32 to vector<128x128xf32>
    %50 = arith.maximumf %48, %49 : vector<128x128xf32>
    %c3_37 = arith.constant 3 : index
    %c0_38 = arith.constant 0 : index
    %c0_39 = arith.constant 0 : index
    %51 = vector.load %arg5[%c3_37, %c0_38, %c0_39] : memref<7x1x128xf32, #tpu.memory_space<vmem>>, vector<1x1x128xf32>
    %52 = vector.shape_cast %51 : vector<1x1x128xf32> to vector<1x128xf32>
    %53 = vector.broadcast %52 : vector<1x128xf32> to vector<128x128xf32>
    %54 = arith.addf %50, %53 : vector<128x128xf32>
    %c3_40 = arith.constant 3 : index
    %c0_41 = arith.constant 0 : index
    %c0_42 = arith.constant 0 : index
    %55 = vector.load %arg3[%c3_40, %c0_41, %c0_42] : memref<6x128x128xbf16, #tpu.memory_space<vmem>>, vector<1x128x128xbf16>
    %56 = vector.shape_cast %55 : vector<1x128x128xbf16> to vector<128x128xbf16>
    %57 = arith.truncf %54 : vector<128x128xf32> to vector<128x128xbf16>
    %cst_43 = arith.constant dense<0.000000e+00> : vector<128x128xf32>
    %58 = tpu.matmul %57, %56, %cst_43 {dimension_numbers = #tpu.dot_dimension_numbers<[1], [0], [0], [1], [0, 0, 1, 1], [], []>} : vector<128x128xbf16>, vector<128x128xbf16>, vector<128x128xf32> -> vector<128x128xf32>
    %c4 = arith.constant 4 : index
    %c0_44 = arith.constant 0 : index
    %c0_45 = arith.constant 0 : index
    %59 = vector.load %arg4[%c4, %c0_44, %c0_45] : memref<7x1x128xf32, #tpu.memory_space<vmem>>, vector<1x1x128xf32>
    %60 = vector.shape_cast %59 : vector<1x1x128xf32> to vector<1x128xf32>
    %61 = vector.broadcast %60 : vector<1x128xf32> to vector<128x128xf32>
    %62 = arith.addf %58, %61 : vector<128x128xf32>
    %cst_46 = arith.constant 0.000000e+00 : f32
    %63 = vector.broadcast %cst_46 : f32 to vector<128x128xf32>
    %64 = arith.maximumf %62, %63 : vector<128x128xf32>
    %c4_47 = arith.constant 4 : index
    %c0_48 = arith.constant 0 : index
    %c0_49 = arith.constant 0 : index
    %65 = vector.load %arg5[%c4_47, %c0_48, %c0_49] : memref<7x1x128xf32, #tpu.memory_space<vmem>>, vector<1x1x128xf32>
    %66 = vector.shape_cast %65 : vector<1x1x128xf32> to vector<1x128xf32>
    %67 = vector.broadcast %66 : vector<1x128xf32> to vector<128x128xf32>
    %68 = arith.addf %64, %67 : vector<128x128xf32>
    %69 = arith.addf %68, %40 : vector<128x128xf32>
    %c4_50 = arith.constant 4 : index
    %c0_51 = arith.constant 0 : index
    %c0_52 = arith.constant 0 : index
    %70 = vector.load %arg3[%c4_50, %c0_51, %c0_52] : memref<6x128x128xbf16, #tpu.memory_space<vmem>>, vector<1x128x128xbf16>
    %71 = vector.shape_cast %70 : vector<1x128x128xbf16> to vector<128x128xbf16>
    %72 = arith.truncf %69 : vector<128x128xf32> to vector<128x128xbf16>
    %cst_53 = arith.constant dense<0.000000e+00> : vector<128x128xf32>
    %73 = tpu.matmul %72, %71, %cst_53 {dimension_numbers = #tpu.dot_dimension_numbers<[1], [0], [0], [1], [0, 0, 1, 1], [], []>} : vector<128x128xbf16>, vector<128x128xbf16>, vector<128x128xf32> -> vector<128x128xf32>
    %c5 = arith.constant 5 : index
    %c0_54 = arith.constant 0 : index
    %c0_55 = arith.constant 0 : index
    %74 = vector.load %arg4[%c5, %c0_54, %c0_55] : memref<7x1x128xf32, #tpu.memory_space<vmem>>, vector<1x1x128xf32>
    %75 = vector.shape_cast %74 : vector<1x1x128xf32> to vector<1x128xf32>
    %76 = vector.broadcast %75 : vector<1x128xf32> to vector<128x128xf32>
    %77 = arith.addf %73, %76 : vector<128x128xf32>
    %cst_56 = arith.constant 0.000000e+00 : f32
    %78 = vector.broadcast %cst_56 : f32 to vector<128x128xf32>
    %79 = arith.maximumf %77, %78 : vector<128x128xf32>
    %c5_57 = arith.constant 5 : index
    %c0_58 = arith.constant 0 : index
    %c0_59 = arith.constant 0 : index
    %80 = vector.load %arg5[%c5_57, %c0_58, %c0_59] : memref<7x1x128xf32, #tpu.memory_space<vmem>>, vector<1x1x128xf32>
    %81 = vector.shape_cast %80 : vector<1x1x128xf32> to vector<1x128xf32>
    %82 = vector.broadcast %81 : vector<1x128xf32> to vector<128x128xf32>
    %83 = arith.addf %79, %82 : vector<128x128xf32>
    %c5_60 = arith.constant 5 : index
    %c0_61 = arith.constant 0 : index
    %c0_62 = arith.constant 0 : index
    %84 = vector.load %arg3[%c5_60, %c0_61, %c0_62] : memref<6x128x128xbf16, #tpu.memory_space<vmem>>, vector<1x128x128xbf16>
    %85 = vector.shape_cast %84 : vector<1x128x128xbf16> to vector<128x128xbf16>
    %86 = arith.truncf %83 : vector<128x128xf32> to vector<128x128xbf16>
    %cst_63 = arith.constant dense<0.000000e+00> : vector<128x128xf32>
    %87 = tpu.matmul %86, %85, %cst_63 {dimension_numbers = #tpu.dot_dimension_numbers<[1], [0], [0], [1], [0, 0, 1, 1], [], []>} : vector<128x128xbf16>, vector<128x128xbf16>, vector<128x128xf32> -> vector<128x128xf32>
    %c6 = arith.constant 6 : index
    %c0_64 = arith.constant 0 : index
    %c0_65 = arith.constant 0 : index
    %88 = vector.load %arg4[%c6, %c0_64, %c0_65] : memref<7x1x128xf32, #tpu.memory_space<vmem>>, vector<1x1x128xf32>
    %89 = vector.shape_cast %88 : vector<1x1x128xf32> to vector<1x128xf32>
    %90 = vector.broadcast %89 : vector<1x128xf32> to vector<128x128xf32>
    %91 = arith.addf %87, %90 : vector<128x128xf32>
    %cst_66 = arith.constant 0.000000e+00 : f32
    %92 = vector.broadcast %cst_66 : f32 to vector<128x128xf32>
    %93 = arith.maximumf %91, %92 : vector<128x128xf32>
    %c6_67 = arith.constant 6 : index
    %c0_68 = arith.constant 0 : index
    %c0_69 = arith.constant 0 : index
    %94 = vector.load %arg5[%c6_67, %c0_68, %c0_69] : memref<7x1x128xf32, #tpu.memory_space<vmem>>, vector<1x1x128xf32>
    %95 = vector.shape_cast %94 : vector<1x1x128xf32> to vector<1x128xf32>
    %96 = vector.broadcast %95 : vector<1x128xf32> to vector<128x128xf32>
    %97 = arith.addf %93, %96 : vector<128x128xf32>
    %98 = arith.addf %97, %69 : vector<128x128xf32>
    %99 = arith.truncf %98 : vector<128x128xf32> to vector<128x128xbf16>
    %c0_70 = arith.constant 0 : index
    %c0_71 = arith.constant 0 : index
    %100 = vector.load %arg6[%c0_70, %c0_71] : memref<128x128xbf16, #tpu.memory_space<vmem>>, vector<128x128xbf16>
    %cst_72 = arith.constant dense<0.000000e+00> : vector<128x128xf32>
    %101 = tpu.matmul %99, %100, %cst_72 {dimension_numbers = #tpu.dot_dimension_numbers<[1], [0], [0], [1], [0, 0, 1, 1], [], []>} : vector<128x128xbf16>, vector<128x128xbf16>, vector<128x128xf32> -> vector<128x128xf32>
    %c0_73 = arith.constant 0 : index
    %c0_74 = arith.constant 0 : index
    %102 = vector.load %arg7[%c0_73, %c0_74] : memref<1x128xf32, #tpu.memory_space<vmem>>, vector<1x128xf32>
    %103 = vector.broadcast %102 : vector<1x128xf32> to vector<128x128xf32>
    %104 = arith.addf %101, %103 : vector<128x128xf32>
    %105 = tpu.transpose %104, [1, 0] : vector<128x128xf32> -> vector<128x128xf32>
    %106 = vector.extract_strided_slice %105 {offsets = [0, 0], sizes = [1, 128], strides = [1, 1]} : vector<128x128xf32> to vector<1x128xf32>
    %cst_75 = arith.constant 1.000000e+01 : f32
    %107 = vector.broadcast %cst_75 : f32 to vector<1x128xf32>
    %108 = arith.mulf %106, %107 : vector<1x128xf32>
    %c0_76 = arith.constant 0 : index
    %c0_77 = arith.constant 0 : index
    %109 = vector.load %arg8[%c0_76, %c0_77] : memref<1x128xf32, #tpu.memory_space<vmem>>, vector<1x128xf32>
    tpu.vector_store %arg8[%c0_76, %c0_77], %108 {strides = array<i32>} : memref<1x128xf32, #tpu.memory_space<vmem>>, vector<1x128xf32>,
    return
  }
  func.func @transform_0(%arg0: i32) -> (i32, i32) {
    %c0_i32 = arith.constant 0 : i32
    %c0_i32_0 = arith.constant 0 : i32
    return %arg0, %c0_i32 : i32, i32
  }
  func.func @transform_1(%arg0: i32) -> (i32, i32) {
    %c0_i32 = arith.constant 0 : i32
    %c0_i32_0 = arith.constant 0 : i32
    %c0_i32_1 = arith.constant 0 : i32
    return %c0_i32, %c0_i32_0 : i32, i32
  }
  func.func @transform_2(%arg0: i32) -> (i32, i32, i32) {
    %c0_i32 = arith.constant 0 : i32
    %c0_i32_0 = arith.constant 0 : i32
    %c0_i32_1 = arith.constant 0 : i32
    %c0_i32_2 = arith.constant 0 : i32
    return %c0_i32, %c0_i32_0, %c0_i32_1 : i32, i32, i32
  }
  func.func @transform_3(%arg0: i32) -> (i32, i32, i32) {
    %c0_i32 = arith.constant 0 : i32
    %c0_i32_0 = arith.constant 0 : i32
    %c0_i32_1 = arith.constant 0 : i32
    %c0_i32_2 = arith.constant 0 : i32
    return %c0_i32, %c0_i32_0, %c0_i32_1 : i32, i32, i32
  }
  func.func @transform_4(%arg0: i32) -> (i32, i32, i32) {
    %c0_i32 = arith.constant 0 : i32
    %c0_i32_0 = arith.constant 0 : i32
    %c0_i32_1 = arith.constant 0 : i32
    %c0_i32_2 = arith.constant 0 : i32
    return %c0_i32, %c0_i32_0, %c0_i32_1 : i32, i32, i32
  }
  func.func @transform_5(%arg0: i32) -> (i32, i32) {
    %c0_i32 = arith.constant 0 : i32
    %c0_i32_0 = arith.constant 0 : i32
    %c0_i32_1 = arith.constant 0 : i32
    return %c0_i32, %c0_i32_0 : i32, i32
  }
  func.func @transform_6(%arg0: i32) -> (i32, i32) {
    %c0_i32 = arith.constant 0 : i32
    %c0_i32_0 = arith.constant 0 : i32
    %c0_i32_1 = arith.constant 0 : i32
    return %c0_i32, %c0_i32_0 : i32, i32
  }
  func.func @transform_7(%arg0: i32) -> (i32, i32) {
    %c0_i32 = arith.constant 0 : i32
    %c0_i32_0 = arith.constant 0 : i32
    return %arg0, %c0_i32 : i32, i32
  }
}

</mosaic_0001>

<bundles_post_ra>
// kernel: tpu_custom_call.1
= control target key start
LH: loop header
LB: loop body
LE: loop exit
PB: predicated region body
PF: predicated region fallthrough
CT: control target
= control target key end

     0   :  { %12 = vsyncpa [#allocation3], 0  ;;  %s3020_s0 = inlined_call_operand.vmem [shape: bf16[128,32], index: 0, kind: input, shape index: {}]   ;;  %s3021_s1 = inlined_call_operand.vmem [shape: bf16[32,128], index: 1, kind: input, shape index: {}]   ;;  %s3022_s2 = inlined_call_operand.hbm [shape: bf16[6,128,128], index: 2, kind: input, shape index: {}]   ;;  %s3023_s3 = inlined_call_operand.vmem [shape: f32[7,1,128], index: 3, kind: input, shape index: {}]   ;;  %s3024_s4 = inlined_call_operand.vmem [shape: f32[7,1,128], index: 4, kind: input, shape index: {}]   ;;  %s3025_s5 = inlined_call_operand.vmem [shape: bf16[128,128], index: 5, kind: input, shape index: {}]   ;;  %s3026_s6 = inlined_call_operand.vmem [shape: f32[1,128], index: 6, kind: input, shape index: {}]   ;;  %s3027_s7 = inlined_call_operand.hbm [shape: f32[1,128], index: 7, kind: output, shape index: {}]  }
   0x1   :  { %13 = vsyncpa [#allocation4], 0  ;;  %s2447_s24 = smov [#allocation2]   ;;  %s2399_s28 = scalar_lea.hbm %s3022_s2, 6144 }
   0x2   :  { %s23_s25 = sshll.u32 %s2447_s24, 4  ;;  %p2400_p0 = scmp.ne.s32.totalorder %s3022_s2, %s2399_s28  ;;  %s24_s25 = int_to_ptr.vmem [resolvable:$true] %s23_s25 }
   0x3   :  { %p2403_p1 = scmp.lt.u32.totalorder %s2399_s28, %s3022_s2 }
   0x5   :  { %p2405_p2 = pnand %p2403_p1, %p2400_p0 }
   0x7   :  { %2408 = shalt.err (!%p2405_p2)
}
   0x8   :  { %s2409_s10 = scalar_lea.vmem %s24_s25, 6144  ;;  %p2414_p4 = scmp.lt.s32.totalorder %s24_s25, %s24_s25 }
   0x9   :  { %p2410_p3 = scmp.ne.s32.totalorder %s24_s25, %s2409_s10  ;;  %p2415_p5 = scmp.lt.s32.totalorder %s2409_s10, %s2409_s10 }
   0xb   :  { %p2416_p6 = por %p2415_p5, %p2414_p4 }
   0xd   :  { %p2417_p7 = pnand %p2416_p6, %p2410_p3 }
   0xf   :  { %2420 = shalt.err (!%p2417_p7)
}
  0x10   :  { %s2448_s11 = smov 64   ;;  %s2449_s12 = smov 4  }
  0x11   :  { %29 = dma.hbm_to_vmem [thread:$0]  %s3022_s2, 6144, %s24_s25, [#allocation3], %s2448_s11, %s2448_s11, %s2449_s12  }
  0x12   :  { %2443 = dma.done.wait [#allocation3], 6144  }
  0x13   :  { %2444 = vsyncadd [#allocation3], 4294961152  ;;  %v2333_v0 = vld [vmem:[%s3021_s1] sm:$0xff]   ;;  %v2334_v1 = vld [vmem:[%s3021_s1 + $0x8] sm:$0xff]   ;;  %vm121_vm0 = vcmask 261120  }
  0x14   :  { %2069 = vmatprep.subr.bf16.mxu0 %v2333_v0  ;;  %v2335_v2 = vld [vmem:[%s3020_s0] sm:$0xff]   ;;  %v2336_v3 = vld [vmem:[%s3020_s0 + $0x8] sm:$0xff]   ;;  %v2337_v4 = vld [vmem:[%s3020_s0 + $0x10] sm:$0xff]  }
  0x15   :  { %2070 = vmatpush3.bf16.msra.mxu0 %v2333_v0  ;;  %2073 = vmatprep.mubr.msk.bf16.mxu0 %vm121_vm0, %v2335_v2  ;;  %v2343_v5 = vld [vmem:[#allocation2] sm:$0xff]   ;;  %v2344_v6 = vld [vmem:[#allocation2 + $0x8] sm:$0xff]   ;;  %v2338_v7 = vld [vmem:[%s3020_s0 + $0x18] sm:$0xff]  }
  0x16   :  { %2071 = vmatprep.subr.bf16.mxu0 %v2334_v1  ;;  %2089 = vmatprep.subr.bf16.mxu1 %v2343_v5  ;;  %v2339_v8 = vld [vmem:[%s3020_s0 + $0x20] sm:$0xff]   ;;  %v2345_v9 = vld [vmem:[#allocation2 + $0x10] sm:$0xff]   ;;  %v2346_v10 = vld [vmem:[#allocation2 + $0x18] sm:$0xff]  }
  0x17   :  { %2090 = vmatpush3.bf16.msra.mxu1 %v2343_v5  ;;  %v2340_v11 = vld [vmem:[%s3020_s0 + $0x28] sm:$0xff]   ;;  %v2347_v12 = vld [vmem:[#allocation2 + $0x20] sm:$0xff]   ;;  %v2341_v13 = vld [vmem:[%s3020_s0 + $0x30] sm:$0xff]  }
  0x18   :  { %2091 = vmatprep.subr.bf16.mxu1 %v2344_v6  ;;  %v2342_v14 = vld [vmem:[%s3020_s0 + $0x38] sm:$0xff]   ;;  %v2348_v15 = vld [vmem:[#allocation2 + $0x28] sm:$0xff]   ;;  %v2349_v16 = vld [vmem:[#allocation2 + $0x30] sm:$0xff]  }
  0x19   :  { %2072 = vmatpush3.bf16.msra.mxu0 %v2334_v1  ;;  %v2350_v17 = vld [vmem:[#allocation2 + $0x38] sm:$0xff]   ;;  %v2351_v18 = vld [vmem:[#allocation2 + $0x40] sm:$0xff]   ;;  %v2352_v19 = vld [vmem:[#allocation2 + $0x48] sm:$0xff]  }
  0x1a   :  { %2121 = vmatprep.subr.bf16.mxu0 %v2351_v18  ;;  %v2353_v20 = vld [vmem:[#allocation2 + $0x50] sm:$0xff]   ;;  %v2354_v21 = vld [vmem:[#allocation2 + $0x58] sm:$0xff]   ;;  %v2355_v22 = vld [vmem:[#allocation2 + $0x60] sm:$0xff]  }
  0x1b   :  { %2092 = vmatpush3.bf16.msra.mxu1 %v2344_v6  ;;  %v2544_v23 = vld [vmem:[%s3023_s3] ss:$0 sm:$0xff] }
  0x1c   :  { %2074 = vmatmul.mubr.msk.bf16.vlgmr.msra.gmra.mrb[0].mxu0 %vm121_vm0, %v2336_v3  ;;  %2093 = vmatprep.subr.bf16.mxu1 %v2345_v9  ;;  %v2552_v32 = vld [vmem:[%s3024_s4] ss:$0 sm:$0xff] }
  0x1d   :  { %2077 = vmatprep.mubr.msk.bf16.mxu0 %vm121_vm0, %v2337_v4  ;;  %2122 = vmatpush3.bf16.msra.mxu0 %v2351_v18 }
  0x1e   :  { %2123 = vmatprep.subr.bf16.mxu0 %v2352_v19 }
  0x1f   :  { %2094 = vmatpush3.bf16.msra.mxu1 %v2345_v9 }
  0x20   :  { %2095 = vmatprep.subr.bf16.mxu1 %v2346_v10 }
  0x21   :  { %2124 = vmatpush3.bf16.msra.mxu0 %v2352_v19 }
  0x22   :  { %2125 = vmatprep.subr.bf16.mxu0 %v2353_v20 }
  0x23   :  { %2096 = vmatpush3.bf16.msra.mxu1 %v2346_v10 }
  0x24   :  { %2078 = vmatmul.mubr.msk.bf16.gmra.mrb[4].mxu0 %vm121_vm0, %v2338_v7  ;;  %2097 = vmatprep.subr.bf16.mxu1 %v2347_v12 }
  0x25   :  { %2081 = vmatprep.mubr.msk.bf16.mxu0 %vm121_vm0, %v2339_v8  ;;  %2126 = vmatpush3.bf16.msra.mxu0 %v2353_v20 }
  0x26   :  { %2127 = vmatprep.subr.bf16.mxu0 %v2354_v21 }
  0x27   :  { %2098 = vmatpush3.bf16.msra.mxu1 %v2347_v12 }
  0x28   :  { %2099 = vmatprep.subr.bf16.mxu1 %v2348_v15 }
  0x29   :  { %2128 = vmatpush3.bf16.msra.mxu0 %v2354_v21 }
  0x2a   :  { %2129 = vmatprep.subr.bf16.mxu0 %v2355_v22 }
  0x2b   :  { %2100 = vmatpush3.bf16.msra.mxu1 %v2348_v15 }
  0x2c   :  { %2082 = vmatmul.mubr.msk.bf16.gmra.mrb[8].mxu0 %vm121_vm0, %v2340_v11  ;;  %2101 = vmatprep.subr.bf16.mxu1 %v2349_v16 }
  0x2d   :  { %2085 = vmatprep.mubr.msk.bf16.mxu0 %vm121_vm0, %v2341_v13  ;;  %2130 = vmatpush3.bf16.msra.mxu0 %v2355_v22 }
  0x2f   :  { %2102 = vmatpush3.bf16.msra.mxu1 %v2349_v16 }
  0x30   :  { %2103 = vmatprep.subr.bf16.mxu1 %v2350_v17 }
  0x33   :  { %2104 = vmatpush3.bf16.msra.mxu1 %v2350_v17 }
  0x34   :  { %2086 = vmatmul.mubr.msk.bf16.gmra.mrb[12].mxu0 %vm121_vm0, %v2342_v14 }
  0xef   :  { %v2075_v24 = vpop.f32.mrb[0].mxu0 }
  0xf0   :  { %v189_v25 = vadd.f32 %v2075_v24, %v2544_v23  ;;  %v180_v26 = vpop.f32.mrb[1].mxu0 }
  0xf1   :  { %v181_v27 = vadd.f32 %v2544_v23, %v180_v26  ;;  %v2076_v28 = vpop.f32.mrb[2].mxu0 }
  0xf2   :  { %v245_v29 = vmax.f32 %v189_v25, 0.0  ;;  %v192_v30 = vadd.f32 %v2076_v28, %v2544_v23  ;;  %v183_v31 = vpop.f32.mrb[3].mxu0 }
  0xf3   :  { %v243_v33 = vmax.f32 %v181_v27, 0.0  ;;  %v184_v34 = vadd.f32 %v2544_v23, %v183_v31 }
  0xf4   :  { %v246_v35 = vmax.f32 %v192_v30, 0.0  ;;  %v268_v37 = vadd.f32 %v2552_v32, %v245_v29 }
  0xf5   :  { %v244_v36 = vmax.f32 %v184_v34, 0.0  ;;  %v266_v40 = vadd.f32 %v2552_v32, %v243_v33 }
  0xf6   :  { %v269_v38 = vadd.f32 %v2552_v32, %v246_v35  ;;  %v2356_v35 = vld [vmem:[#allocation2 + $0x68] sm:$0xff]  }
  0xf7   :  { %v2079_v39 = vpop.f32.mrb[4].mxu0  ;;  %v267_v41 = vadd.f32 %v2552_v32, %v244_v36  ;;  %2131 = vmatprep.subr.bf16.mxu0 %v2356_v35  ;;  %v2358_v36 = vld [vmem:[#allocation2 + $0x78] sm:$0xff]  }
  0xf8   :  { %v205_v42 = vadd.f32 %v2079_v39, %v2544_v23  ;;  %v196_v43 = vpop.f32.mrb[5].mxu0  ;;  %v299_v44 = vpack.c.bf16 %v269_v38, %v268_v37  ;;  %2132 = vmatpush3.bf16.msra.mxu0 %v2356_v35  ;;  %v2359_v37 = vld [vmem:[#allocation2 + $0x80] sm:$0xff]   ;;  %v2360_v38 = vld [vmem:[#allocation2 + $0x88] sm:$0xff]   ;;  %v2361_v39 = vld [vmem:[#allocation2 + $0x90] sm:$0xff]  }
  0xf9   :  { %v197_v45 = vadd.f32 %v2544_v23, %v196_v43  ;;  %v2080_v46 = vpop.f32.mrb[6].mxu0  ;;  %v298_v47 = vpack.c.bf16 %v267_v41, %v266_v40  ;;  %2153 = vmatprep.subr.bf16.mxu1 %v2359_v37  ;;  %v2363_v40 = vld [vmem:[#allocation2 + $0xa0] sm:$0xff]  }
  0xfa   :  { %v249_v48 = vmax.f32 %v205_v42, 0.0  ;;  %v208_v49 = vadd.f32 %v2080_v46, %v2544_v23  ;;  %v199_v50 = vpop.f32.mrb[7].mxu0  ;;  %v2586_v41 = vld [vmem:[%s3023_s3 + $0x1] ss:$0 sm:$0xff] }
  0xfb   :  { %v247_v51 = vmax.f32 %v197_v45, 0.0  ;;  %v200_v52 = vadd.f32 %v2544_v23, %v199_v50  ;;  %2105 = vmatprep.mubr.bf16.mxu1 %v298_v47  ;;  %v2594_v50 = vld [vmem:[%s3024_s4 + $0x1] ss:$0 sm:$0xff] }
  0xfc   :  { %v272_v53 = vadd.f32 %v2552_v32, %v249_v48  ;;  %v250_v54 = vmax.f32 %v208_v49, 0.0  ;;  %2106 = vmatmul.mubr.bf16.vlgmr.msra.gmra.mrb[0].mxu1 %v299_v44 }
  0xfd   :  { %v270_v55 = vadd.f32 %v2552_v32, %v247_v51  ;;  %v248_v56 = vmax.f32 %v200_v52, 0.0  ;;  %2154 = vmatpush3.bf16.msra.mxu1 %v2359_v37 }
  0xfe   :  { %v273_v57 = vadd.f32 %v2552_v32, %v250_v54  ;;  %2155 = vmatprep.subr.bf16.mxu1 %v2360_v38 }
  0xff   :  { %v271_v58 = vadd.f32 %v2552_v32, %v248_v56  ;;  %v2083_v59 = vpop.f32.mrb[8].mxu0 }
 0x100   :  { %v221_v60 = vadd.f32 %v2083_v59, %v2544_v23  ;;  %v212_v61 = vpop.f32.mrb[9].mxu0  ;;  %v301_v62 = vpack.c.bf16 %v273_v57, %v272_v53 }
 0x101   :  { %v213_v63 = vadd.f32 %v2544_v23, %v212_v61  ;;  %v2084_v0 = vpop.f32.mrb[10].mxu0  ;;  %v300_v1 = vpack.c.bf16 %v271_v58, %v270_v55  ;;  %2156 = vmatpush3.bf16.msra.mxu1 %v2360_v38 }
 0x102   :  { %v253_v2 = vmax.f32 %v221_v60, 0.0  ;;  %v224_v3 = vadd.f32 %v2084_v0, %v2544_v23  ;;  %v215_v4 = vpop.f32.mrb[11].mxu0  ;;  %2157 = vmatprep.subr.bf16.mxu1 %v2361_v39 }
 0x103   :  { %v251_v5 = vmax.f32 %v213_v63, 0.0  ;;  %v216_v6 = vadd.f32 %v2544_v23, %v215_v4  ;;  %2109 = vmatprep.mubr.bf16.mxu1 %v300_v1 }
 0x104   :  { %v276_v7 = vadd.f32 %v2552_v32, %v253_v2  ;;  %v254_v8 = vmax.f32 %v224_v3, 0.0  ;;  %2110 = vmatmul.mubr.bf16.gmra.mrb[4].mxu1 %v301_v62 }
 0x105   :  { %v274_v9 = vadd.f32 %v2552_v32, %v251_v5  ;;  %v252_v10 = vmax.f32 %v216_v6, 0.0  ;;  %2158 = vmatpush3.bf16.msra.mxu1 %v2361_v39 }
 0x106   :  { %v277_v11 = vadd.f32 %v2552_v32, %v254_v8 }
 0x107   :  { %v275_v12 = vadd.f32 %v2552_v32, %v252_v10  ;;  %v2087_v13 = vpop.f32.mrb[12].mxu0 }
 0x108   :  { %v237_v14 = vadd.f32 %v2087_v13, %v2544_v23  ;;  %v228_v15 = vpop.f32.mrb[13].mxu0  ;;  %v303_v16 = vpack.c.bf16 %v277_v11, %v276_v7 }
 0x109   :  { %v229_v17 = vadd.f32 %v2544_v23, %v228_v15  ;;  %v2088_v18 = vpop.f32.mrb[14].mxu0  ;;  %v302_v19 = vpack.c.bf16 %v275_v12, %v274_v9 }
 0x10a   :  { %v257_v20 = vmax.f32 %v237_v14, 0.0  ;;  %v240_v21 = vadd.f32 %v2088_v18, %v2544_v23  ;;  %v231_v22 = vpop.f32.mrb[15].mxu0 }
 0x10b   :  { %v255_v24 = vmax.f32 %v229_v17, 0.0  ;;  %v232_v25 = vadd.f32 %v2544_v23, %v231_v22  ;;  %2113 = vmatprep.mubr.bf16.mxu1 %v302_v19  ;;  %v2357_v23 = vld [vmem:[#allocation2 + $0x70] sm:$0xff]  }
 0x10c   :  { %v280_v26 = vadd.f32 %v2552_v32, %v257_v20  ;;  %v258_v27 = vmax.f32 %v240_v21, 0.0  ;;  %2114 = vmatmul.mubr.bf16.gmra.mrb[8].mxu1 %v303_v16  ;;  %2133 = vmatprep.subr.bf16.mxu0 %v2357_v23 }
 0x10d   :  { %v278_v28 = vadd.f32 %v2552_v32, %v255_v24  ;;  %v256_v29 = vmax.f32 %v232_v25, 0.0  ;;  %2134 = vmatpush3.bf16.msra.mxu0 %v2357_v23 }
 0x10e   :  { %v281_v30 = vadd.f32 %v2552_v32, %v258_v27  ;;  %2135 = vmatprep.subr.bf16.mxu0 %v2358_v36 }
 0x10f   :  { %v279_v31 = vadd.f32 %v2552_v32, %v256_v29  ;;  %v2362_v32 = vld [vmem:[#allocation2 + $0x98] sm:$0xff]  }
 0x110   :  { %v305_v33 = vpack.c.bf16 %v281_v30, %v280_v26  ;;  %2159 = vmatprep.subr.bf16.mxu1 %v2362_v32 }
 0x111   :  { %v304_v34 = vpack.c.bf16 %v279_v31, %v278_v28  ;;  %2136 = vmatpush3.bf16.msra.mxu0 %v2358_v36  ;;  %2160 = vmatpush3.bf16.msra.mxu1 %v2362_v32 }
 0x112   :  { %2161 = vmatprep.subr.bf16.mxu1 %v2363_v40 }
 0x113   :  { %2117 = vmatprep.mubr.bf16.mxu1 %v304_v34 }
 0x114   :  { %2118 = vmatmul.mubr.bf16.gmra.mrb[12].mxu1 %v305_v33 }
 0x115   :  { %2162 = vmatpush3.bf16.msra.mxu1 %v2363_v40 }
 0x1cf   :  { %v2107_v42 = vpop.f32.mrb[0].mxu1 }
 0x1d0   :  { %v405_v43 = vadd.f32 %v2107_v42, %v2586_v41  ;;  %v396_v44 = vpop.f32.mrb[1].mxu1 }
 0x1d1   :  { %v397_v45 = vadd.f32 %v2586_v41, %v396_v44  ;;  %v2108_v46 = vpop.f32.mrb[2].mxu1 }
 0x1d2   :  { %v461_v47 = vmax.f32 %v405_v43, 0.0  ;;  %v408_v48 = vadd.f32 %v2108_v46, %v2586_v41  ;;  %v399_v49 = vpop.f32.mrb[3].mxu1 }
 0x1d3   :  { %v459_v51 = vmax.f32 %v397_v45, 0.0  ;;  %v400_v52 = vadd.f32 %v2586_v41, %v399_v49 }
 0x1d4   :  { %v462_v53 = vmax.f32 %v408_v48, 0.0  ;;  %v485_v55 = vadd.f32 %v2594_v50, %v461_v47 }
 0x1d5   :  { %v460_v54 = vmax.f32 %v400_v52, 0.0  ;;  %v483_v57 = vadd.f32 %v2594_v50, %v459_v51 }
 0x1d6   :  { %v486_v56 = vadd.f32 %v2594_v50, %v462_v53  ;;  %v2364_v53 = vld [vmem:[#allocation2 + $0xa8] sm:$0xff]  }
 0x1d7   :  { %v484_v58 = vadd.f32 %v2594_v50, %v460_v54  ;;  %v2111_v59 = vpop.f32.mrb[4].mxu1  ;;  %2163 = vmatprep.subr.bf16.mxu1 %v2364_v53  ;;  %v2366_v54 = vld [vmem:[#allocation2 + $0xb8] sm:$0xff]  }
 0x1d8   :  { %v517_v60 = vpack.c.bf16 %v486_v56, %v485_v55  ;;  %v421_v61 = vadd.f32 %v2111_v59, %v2586_v41  ;;  %v412_v62 = vpop.f32.mrb[5].mxu1  ;;  %2164 = vmatpush3.bf16.msra.mxu1 %v2364_v53  ;;  %v2367_v55 = vld [vmem:[#allocation2 + $0xc0] sm:$0xff]   ;;  %v2368_v56 = vld [vmem:[#allocation2 + $0xc8] sm:$0xff]  }
 0x1d9   :  { %v413_v63 = vadd.f32 %v2586_v41, %v412_v62  ;;  %v2112_v0 = vpop.f32.mrb[6].mxu1  ;;  %v516_v1 = vpack.c.bf16 %v484_v58, %v483_v57  ;;  %2185 = vmatprep.subr.bf16.mxu0 %v2367_v55  ;;  %v2369_v57 = vld [vmem:[#allocation2 + $0xd0] sm:$0xff]   ;;  %v2371_v58 = vld [vmem:[#allocation2 + $0xe0] sm:$0xff]  }
 0x1da   :  { %v465_v2 = vmax.f32 %v421_v61, 0.0  ;;  %v424_v3 = vadd.f32 %v2112_v0, %v2586_v41  ;;  %v415_v4 = vpop.f32.mrb[7].mxu1  ;;  %v2628_v59 = vld [vmem:[%s3023_s3 + $0x2] ss:$0 sm:$0xff] }
 0x1db   :  { %v463_v5 = vmax.f32 %v413_v63, 0.0  ;;  %v416_v6 = vadd.f32 %v2586_v41, %v415_v4  ;;  %2137 = vmatprep.mubr.bf16.mxu0 %v516_v1 }
 0x1dc   :  { %v489_v7 = vadd.f32 %v2594_v50, %v465_v2  ;;  %v466_v8 = vmax.f32 %v424_v3, 0.0  ;;  %2138 = vmatmul.mubr.bf16.vlgmr.msra.gmra.mrb[16].mxu0 %v517_v60 }
 0x1dd   :  { %v487_v9 = vadd.f32 %v2594_v50, %v463_v5  ;;  %v464_v10 = vmax.f32 %v416_v6, 0.0  ;;  %2186 = vmatpush3.bf16.msra.mxu0 %v2367_v55  ;;  %v2637_v6 = vld [vmem:[%s3024_s4 + $0x2] ss:$0 sm:$0xff] }
 0x1de   :  { %v490_v11 = vadd.f32 %v2594_v50, %v466_v8  ;;  %2187 = vmatprep.subr.bf16.mxu0 %v2368_v56 }
 0x1df   :  { %v488_v12 = vadd.f32 %v2594_v50, %v464_v10  ;;  %v2115_v13 = vpop.f32.mrb[8].mxu1 }
 0x1e0   :  { %v437_v14 = vadd.f32 %v2115_v13, %v2586_v41  ;;  %v428_v15 = vpop.f32.mrb[9].mxu1  ;;  %v519_v16 = vpack.c.bf16 %v490_v11, %v489_v7 }
 0x1e1   :  { %v429_v17 = vadd.f32 %v2586_v41, %v428_v15  ;;  %v2116_v18 = vpop.f32.mrb[10].mxu1  ;;  %v518_v19 = vpack.c.bf16 %v488_v12, %v487_v9  ;;  %2188 = vmatpush3.bf16.msra.mxu0 %v2368_v56 }
 0x1e2   :  { %v469_v20 = vmax.f32 %v437_v14, 0.0  ;;  %v440_v21 = vadd.f32 %v2116_v18, %v2586_v41  ;;  %v431_v22 = vpop.f32.mrb[11].mxu1  ;;  %2189 = vmatprep.subr.bf16.mxu0 %v2369_v57 }
 0x1e3   :  { %v467_v24 = vmax.f32 %v429_v17, 0.0  ;;  %v432_v25 = vadd.f32 %v2586_v41, %v431_v22  ;;  %2141 = vmatprep.mubr.bf16.mxu0 %v518_v19 }
 0x1e4   :  { %v493_v26 = vadd.f32 %v2594_v50, %v469_v20  ;;  %v470_v27 = vmax.f32 %v440_v21, 0.0  ;;  %2142 = vmatmul.mubr.bf16.gmra.mrb[20].mxu0 %v519_v16 }
 0x1e5   :  { %v491_v28 = vadd.f32 %v2594_v50, %v467_v24  ;;  %v468_v29 = vmax.f32 %v432_v25, 0.0  ;;  %2190 = vmatpush3.bf16.msra.mxu0 %v2369_v57 }
 0x1e6   :  { %v494_v30 = vadd.f32 %v2594_v50, %v470_v27 }
 0x1e7   :  { %v492_v31 = vadd.f32 %v2594_v50, %v468_v29  ;;  %v2119_v33 = vpop.f32.mrb[12].mxu1 }
 0x1e8   :  { %v453_v34 = vadd.f32 %v2119_v33, %v2586_v41  ;;  %v444_v35 = vpop.f32.mrb[13].mxu1  ;;  %v521_v23 = vpack.c.bf16 %v494_v30, %v493_v26 }
 0x1e9   :  { %v445_v36 = vadd.f32 %v2586_v41, %v444_v35  ;;  %v2120_v37 = vpop.f32.mrb[14].mxu1  ;;  %v520_v38 = vpack.c.bf16 %v492_v31, %v491_v28 }
 0x1ea   :  { %v473_v39 = vmax.f32 %v453_v34, 0.0  ;;  %v456_v32 = vadd.f32 %v2120_v37, %v2586_v41  ;;  %v447_v40 = vpop.f32.mrb[15].mxu1 }
 0x1eb   :  { %v471_v42 = vmax.f32 %v445_v36, 0.0  ;;  %v448_v43 = vadd.f32 %v2586_v41, %v447_v40  ;;  %2145 = vmatprep.mubr.bf16.mxu0 %v520_v38  ;;  %v2365_v41 = vld [vmem:[#allocation2 + $0xb0] sm:$0xff]  }
 0x1ec   :  { %v497_v44 = vadd.f32 %v2594_v50, %v473_v39  ;;  %v474_v45 = vmax.f32 %v456_v32, 0.0  ;;  %2146 = vmatmul.mubr.bf16.gmra.mrb[24].mxu0 %v521_v23  ;;  %2165 = vmatprep.subr.bf16.mxu1 %v2365_v41 }
 0x1ed   :  { %v495_v46 = vadd.f32 %v2594_v50, %v471_v42  ;;  %v472_v47 = vmax.f32 %v448_v43, 0.0  ;;  %2166 = vmatpush3.bf16.msra.mxu1 %v2365_v41 }
 0x1ee   :  { %v498_v48 = vadd.f32 %v2594_v50, %v474_v45  ;;  %2167 = vmatprep.subr.bf16.mxu1 %v2366_v54 }
 0x1ef   :  { %v496_v49 = vadd.f32 %v2594_v50, %v472_v47  ;;  %v2370_v50 = vld [vmem:[#allocation2 + $0xd8] sm:$0xff]  }
 0x1f0   :  { %v523_v51 = vpack.c.bf16 %v498_v48, %v497_v44  ;;  %2191 = vmatprep.subr.bf16.mxu0 %v2370_v50 }
 0x1f1   :  { %v522_v52 = vpack.c.bf16 %v496_v49, %v495_v46  ;;  %2168 = vmatpush3.bf16.msra.mxu1 %v2366_v54  ;;  %2192 = vmatpush3.bf16.msra.mxu0 %v2370_v50 }
 0x1f2   :  { %2193 = vmatprep.subr.bf16.mxu0 %v2371_v58 }
 0x1f3   :  { %2149 = vmatprep.mubr.bf16.mxu0 %v522_v52 }
 0x1f4   :  { %2150 = vmatmul.mubr.bf16.gmra.mrb[28].mxu0 %v523_v51 }
 0x1f5   :  { %2194 = vmatpush3.bf16.msra.mxu0 %v2371_v58 }
 0x2af   :  { %v2139_v60 = vpop.f32.mrb[16].mxu0 }
 0x2b0   :  { %v623_v61 = vadd.f32 %v2139_v60, %v2628_v59  ;;  %v614_v62 = vpop.f32.mrb[17].mxu0 }
 0x2b1   :  { %v615_v63 = vadd.f32 %v2628_v59, %v614_v62  ;;  %v2140_v0 = vpop.f32.mrb[18].mxu0 }
 0x2b2   :  { %v626_v1 = vadd.f32 %v2140_v0, %v2628_v59  ;;  %v617_v2 = vpop.f32.mrb[19].mxu0  ;;  %v679_v5 = vmax.f32 %v623_v61, 0.0 }
 0x2b3   :  { %v677_v3 = vmax.f32 %v615_v63, 0.0  ;;  %v618_v4 = vadd.f32 %v2628_v59, %v617_v2 }
 0x2b4   :  { %v680_v7 = vmax.f32 %v626_v1, 0.0  ;;  %v2649_v13 = vadd.f32 %v2637_v6, %v679_v5  ;;  %v2372_v5 = vld [vmem:[#allocation2 + $0xe8] sm:$0xff]  }
 0x2b5   :  { %v678_v8 = vmax.f32 %v618_v4, 0.0  ;;  %v2643_v10 = vadd.f32 %v2637_v6, %v677_v3  ;;  %2195 = vmatprep.subr.bf16.mxu0 %v2372_v5 }
 0x2b6   :  { %v2640_v9 = vadd.f32 %v2637_v6, %v680_v7  ;;  %2196 = vmatpush3.bf16.msra.mxu0 %v2372_v5  ;;  %v2373_v7 = vld [vmem:[#allocation2 + $0xf0] sm:$0xff]  }
 0x2b7   :  { %v2646_v11 = vadd.f32 %v2637_v6, %v678_v8  ;;  %v2143_v12 = vpop.f32.mrb[20].mxu0  ;;  %2197 = vmatprep.subr.bf16.mxu0 %v2373_v7  ;;  %v2374_v8 = vld [vmem:[#allocation2 + $0xf8] sm:$0xff]  }
 0x2b8   :  { %v639_v14 = vadd.f32 %v2143_v12, %v2628_v59  ;;  %v630_v15 = vpop.f32.mrb[21].mxu0  ;;  %v735_v19 = vpack.c.bf16 %v2640_v9, %v2649_v13  ;;  %v2375_v12 = vld [vmem:[#allocation2 + $0x100] sm:$0xff]  }
 0x2b9   :  { %v631_v16 = vadd.f32 %v2628_v59, %v630_v15  ;;  %v2144_v17 = vpop.f32.mrb[22].mxu0  ;;  %v734_v18 = vpack.c.bf16 %v2646_v11, %v2643_v10  ;;  %2217 = vmatprep.subr.bf16.mxu1 %v2375_v12  ;;  %v2378_v15 = vld [vmem:[#allocation2 + $0x118] sm:$0xff]  }
 0x2ba   :  { %v642_v20 = vadd.f32 %v2144_v17, %v2628_v59  ;;  %v633_v21 = vpop.f32.mrb[23].mxu0  ;;  %v683_v25 = vmax.f32 %v639_v14, 0.0  ;;  %2198 = vmatpush3.bf16.msra.mxu0 %v2373_v7  ;;  %v2377_v14 = vld [vmem:[#allocation2 + $0x110] sm:$0xff]   ;;  %v2718_v17 = vld [vmem:[%s3023_s3 + $0x3] ss:$0 sm:$0xff] }
 0x2bb   :  { %v681_v22 = vmax.f32 %v631_v16, 0.0  ;;  %v634_v24 = vadd.f32 %v2628_v59, %v633_v21  ;;  %2169 = vmatprep.mubr.bf16.mxu1 %v734_v18  ;;  %2199 = vmatprep.subr.bf16.mxu0 %v2374_v8  ;;  %v2379_v16 = vld [vmem:[#allocation2 + $0x120] sm:$0xff]  }
 0x2bc   :  { %v684_v26 = vmax.f32 %v642_v20, 0.0  ;;  %2170 = vmatmul.mubr.bf16.vlgmr.msra.gmra.mrb[16].mxu1 %v735_v19  ;;  %v2669_v33 = vadd.f32 %v2637_v6, %v683_v25 }
 0x2bd   :  { %v682_v27 = vmax.f32 %v634_v24, 0.0  ;;  %v2663_v29 = vadd.f32 %v2637_v6, %v681_v22  ;;  %2218 = vmatpush3.bf16.msra.mxu1 %v2375_v12 }
 0x2be   :  { %v2660_v28 = vadd.f32 %v2637_v6, %v684_v26  ;;  %2200 = vmatpush3.bf16.msra.mxu0 %v2374_v8 }
 0x2bf   :  { %v2666_v30 = vadd.f32 %v2637_v6, %v682_v27  ;;  %v2147_v31 = vpop.f32.mrb[24].mxu0  ;;  %v2726_v27 = vld [vmem:[%s3024_s4 + $0x3] ss:$0 sm:$0xff] }
 0x2c0   :  { %v655_v34 = vadd.f32 %v2147_v31, %v2628_v59  ;;  %v646_v35 = vpop.f32.mrb[25].mxu0  ;;  %v737_v40 = vpack.c.bf16 %v2660_v28, %v2669_v33 }
 0x2c1   :  { %v647_v23 = vadd.f32 %v2628_v59, %v646_v35  ;;  %v2148_v36 = vpop.f32.mrb[26].mxu0  ;;  %v736_v37 = vpack.c.bf16 %v2666_v30, %v2663_v29 }
 0x2c2   :  { %v687_v38 = vmax.f32 %v655_v34, 0.0  ;;  %v658_v39 = vadd.f32 %v2148_v36, %v2628_v59  ;;  %v649_v32 = vpop.f32.mrb[27].mxu0 }
 0x2c3   :  { %v685_v42 = vmax.f32 %v647_v23, 0.0  ;;  %v650_v43 = vadd.f32 %v2628_v59, %v649_v32  ;;  %2173 = vmatprep.mubr.bf16.mxu1 %v736_v37 }
 0x2c4   :  { %v2680_v44 = vadd.f32 %v2637_v6, %v687_v38  ;;  %v688_v45 = vmax.f32 %v658_v39, 0.0  ;;  %2174 = vmatmul.mubr.bf16.gmra.mrb[20].mxu1 %v737_v40 }
 0x2c5   :  { %v2683_v46 = vadd.f32 %v2637_v6, %v685_v42  ;;  %v686_v47 = vmax.f32 %v650_v43, 0.0 }
 0x2c6   :  { %v2686_v48 = vadd.f32 %v2637_v6, %v688_v45 }
 0x2c7   :  { %v2689_v49 = vadd.f32 %v2637_v6, %v686_v47  ;;  %v2151_v51 = vpop.f32.mrb[28].mxu0 }
 0x2c8   :  { %v671_v52 = vadd.f32 %v2151_v51, %v2628_v59  ;;  %v662_v53 = vpop.f32.mrb[29].mxu0  ;;  %v739_v41 = vpack.c.bf16 %v2686_v48, %v2680_v44 }
 0x2c9   :  { %v663_v54 = vadd.f32 %v2628_v59, %v662_v53  ;;  %v2152_v55 = vpop.f32.mrb[30].mxu0  ;;  %v738_v56 = vpack.c.bf16 %v2689_v49, %v2683_v46 }
 0x2ca   :  { %v691_v57 = vmax.f32 %v671_v52, 0.0  ;;  %v674_v50 = vadd.f32 %v2152_v55, %v2628_v59  ;;  %v665_v58 = vpop.f32.mrb[31].mxu0 }
 0x2cb   :  { %v689_v60 = vmax.f32 %v663_v54, 0.0  ;;  %v666_v61 = vadd.f32 %v2628_v59, %v665_v58  ;;  %2177 = vmatprep.mubr.bf16.mxu1 %v738_v56 }
 0x2cc   :  { %v2700_v62 = vadd.f32 %v2637_v6, %v691_v57  ;;  %v692_v63 = vmax.f32 %v674_v50, 0.0  ;;  %2178 = vmatmul.mubr.bf16.gmra.mrb[24].mxu1 %v739_v41 }
 0x2cd   :  { %v2703_v0 = vadd.f32 %v2637_v6, %v689_v60  ;;  %v690_v1 = vmax.f32 %v666_v61, 0.0 }
 0x2ce   :  { %v2706_v2 = vadd.f32 %v2637_v6, %v692_v63 }
 0x2cf   :  { %v2709_v3 = vadd.f32 %v2637_v6, %v690_v1  ;;  %v2376_v6 = vld [vmem:[#allocation2 + $0x108] sm:$0xff]  }
 0x2d0   :  { %v741_v4 = vpack.c.bf16 %v2706_v2, %v2700_v62  ;;  %2219 = vmatprep.subr.bf16.mxu1 %v2376_v6 }
 0x2d1   :  { %v740_v59 = vpack.c.bf16 %v2709_v3, %v2703_v0  ;;  %2220 = vmatpush3.bf16.msra.mxu1 %v2376_v6 }
 0x2d2   :  { %2221 = vmatprep.subr.bf16.mxu1 %v2377_v14 }
 0x2d3   :  { %2181 = vmatprep.mubr.bf16.mxu1 %v740_v59 }
 0x2d4   :  { %2182 = vmatmul.mubr.bf16.gmra.mrb[28].mxu1 %v741_v4 }
 0x2d5   :  { %2222 = vmatpush3.bf16.msra.mxu1 %v2377_v14 }
 0x2d6   :  { %2223 = vmatprep.subr.bf16.mxu1 %v2378_v15 }
 0x2d9   :  { %2224 = vmatpush3.bf16.msra.mxu1 %v2378_v15 }
 0x2da   :  { %2225 = vmatprep.subr.bf16.mxu1 %v2379_v16 }
 0x2dd   :  { %2226 = vmatpush3.bf16.msra.mxu1 %v2379_v16 }
 0x38f   :  { %v2171_v18 = vpop.f32.mrb[16].mxu1 }
 0x390   :  { %v841_v19 = vadd.f32 %v2171_v18, %v2718_v17  ;;  %v832_v20 = vpop.f32.mrb[17].mxu1 }
 0x391   :  { %v833_v21 = vadd.f32 %v2718_v17, %v832_v20  ;;  %v2172_v22 = vpop.f32.mrb[18].mxu1 }
 0x392   :  { %v897_v24 = vmax.f32 %v841_v19, 0.0  ;;  %v844_v25 = vadd.f32 %v2172_v22, %v2718_v17  ;;  %v835_v26 = vpop.f32.mrb[19].mxu1 }
 0x393   :  { %v895_v31 = vmax.f32 %v833_v21, 0.0  ;;  %v836_v34 = vadd.f32 %v2718_v17, %v835_v26 }
 0x394   :  { %v898_v35 = vmax.f32 %v844_v25, 0.0  ;;  %v921_v36 = vadd.f32 %v2726_v27, %v897_v24 }
 0x395   :  { %v896_v23 = vmax.f32 %v836_v34, 0.0  ;;  %v919_v38 = vadd.f32 %v2726_v27, %v895_v31 }
 0x396   :  { %v922_v37 = vadd.f32 %v2726_v27, %v898_v35 }
 0x397   :  { %v920_v39 = vadd.f32 %v2726_v27, %v896_v23  ;;  %v2175_v32 = vpop.f32.mrb[20].mxu1 }
 0x398   :  { %v953_v40 = vpack.c.bf16 %v922_v37, %v921_v36  ;;  %v857_v42 = vadd.f32 %v2175_v32, %v2718_v17  ;;  %v848_v43 = vpop.f32.mrb[21].mxu1 }
 0x399   :  { %v849_v45 = vadd.f32 %v2718_v17, %v848_v43  ;;  %v2176_v47 = vpop.f32.mrb[22].mxu1  ;;  %v952_v51 = vpack.c.bf16 %v920_v39, %v919_v38 }
 0x39a   :  { %v901_v52 = vmax.f32 %v857_v42, 0.0  ;;  %v860_v53 = vadd.f32 %v2176_v47, %v2718_v17  ;;  %v851_v41 = vpop.f32.mrb[23].mxu1 }
 0x39b   :  { %v899_v54 = vmax.f32 %v849_v45, 0.0  ;;  %v852_v55 = vadd.f32 %v2718_v17, %v851_v41  ;;  %2201 = vmatprep.mubr.bf16.mxu0 %v952_v51 }
 0x39c   :  { %v902_v56 = vmax.f32 %v860_v53, 0.0  ;;  %2202 = vmatmul.mubr.bf16.vlgmr.msra.gmra.mrb[32].mxu0 %v953_v40  ;;  %v925_v50 = vadd.f32 %v2726_v27, %v901_v52 }
 0x39d   :  { %v900_v57 = vmax.f32 %v852_v55, 0.0  ;;  %v923_v60 = vadd.f32 %v2726_v27, %v899_v54  ;;  %v2380_v54 = vld [vmem:[#allocation2 + $0x128] sm:$0xff]   ;;  %v2382_v55 = vld [vmem:[#allocation2 + $0x138] sm:$0xff]  }
 0x39e   :  { %v926_v58 = vadd.f32 %v2726_v27, %v902_v56  ;;  %2227 = vmatprep.subr.bf16.mxu1 %v2380_v54  ;;  %v2383_v56 = vld [vmem:[#allocation2 + $0x140] sm:$0xff]  }
 0x39f   :  { %v924_v61 = vadd.f32 %v2726_v27, %v900_v57  ;;  %v2179_v63 = vpop.f32.mrb[24].mxu1  ;;  %2228 = vmatpush3.bf16.msra.mxu1 %v2380_v54  ;;  %v2384_v57 = vld [vmem:[#allocation2 + $0x148] sm:$0xff]   ;;  %2249 = vmatprep.subr.bf16.mxu0 %v2383_v56 }
 0x3a0   :  { %v873_v1 = vadd.f32 %v2179_v63, %v2718_v17  ;;  %v864_v4 = vpop.f32.mrb[25].mxu1  ;;  %v955_v59 = vpack.c.bf16 %v926_v58, %v925_v50  ;;  %2250 = vmatpush3.bf16.msra.mxu0 %v2383_v56  ;;  %v2385_v50 = vld [vmem:[#allocation2 + $0x150] sm:$0xff]   ;;  %v2387_v58 = vld [vmem:[#allocation2 + $0x160] sm:$0xff]  }
 0x3a1   :  { %v865_v5 = vadd.f32 %v2718_v17, %v864_v4  ;;  %v2180_v7 = vpop.f32.mrb[26].mxu1  ;;  %v954_v8 = vpack.c.bf16 %v924_v61, %v923_v60  ;;  %2251 = vmatprep.subr.bf16.mxu0 %v2384_v57  ;;  %v2760_v60 = vld [vmem:[%s3023_s3 + $0x4] ss:$0 sm:$0xff] }
 0x3a2   :  { %v905_v12 = vmax.f32 %v873_v1, 0.0  ;;  %v876_v6 = vadd.f32 %v2180_v7, %v2718_v17  ;;  %v867_v14 = vpop.f32.mrb[27].mxu1  ;;  %v2767_v7 = vld [vmem:[%s3024_s4 + $0x4] ss:$0 sm:$0xff] }
 0x3a3   :  { %v903_v15 = vmax.f32 %v865_v5, 0.0  ;;  %v868_v16 = vadd.f32 %v2718_v17, %v867_v14  ;;  %2205 = vmatprep.mubr.bf16.mxu0 %v954_v8 }
 0x3a4   :  { %v929_v18 = vadd.f32 %v2726_v27, %v905_v12  ;;  %v906_v19 = vmax.f32 %v876_v6, 0.0  ;;  %2206 = vmatmul.mubr.bf16.gmra.mrb[36].mxu0 %v955_v59 }
 0x3a5   :  { %v927_v20 = vadd.f32 %v2726_v27, %v903_v15  ;;  %v904_v21 = vmax.f32 %v868_v16, 0.0  ;;  %2252 = vmatpush3.bf16.msra.mxu0 %v2384_v57 }
 0x3a6   :  { %v930_v22 = vadd.f32 %v2726_v27, %v906_v19  ;;  %2253 = vmatprep.subr.bf16.mxu0 %v2385_v50 }
 0x3a7   :  { %v928_v24 = vadd.f32 %v2726_v27, %v904_v21  ;;  %v2183_v25 = vpop.f32.mrb[28].mxu1 }
 0x3a8   :  { %v889_v26 = vadd.f32 %v2183_v25, %v2718_v17  ;;  %v880_v31 = vpop.f32.mrb[29].mxu1  ;;  %v957_v34 = vpack.c.bf16 %v930_v22, %v929_v18 }
 0x3a9   :  { %v881_v35 = vadd.f32 %v2718_v17, %v880_v31  ;;  %v2184_v23 = vpop.f32.mrb[30].mxu1  ;;  %v956_v36 = vpack.c.bf16 %v928_v24, %v927_v20  ;;  %2254 = vmatpush3.bf16.msra.mxu0 %v2385_v50 }
 0x3aa   :  { %v909_v37 = vmax.f32 %v889_v26, 0.0  ;;  %v892_v38 = vadd.f32 %v2184_v23, %v2718_v17  ;;  %v883_v39 = vpop.f32.mrb[31].mxu1 }
 0x3ab   :  { %v907_v32 = vmax.f32 %v881_v35, 0.0  ;;  %v884_v40 = vadd.f32 %v2718_v17, %v883_v39  ;;  %2209 = vmatprep.mubr.bf16.mxu0 %v956_v36  ;;  %v2381_v17 = vld [vmem:[#allocation2 + $0x130] sm:$0xff]  }
 0x3ac   :  { %v933_v42 = vadd.f32 %v2726_v27, %v909_v37  ;;  %v910_v43 = vmax.f32 %v892_v38, 0.0  ;;  %2210 = vmatmul.mubr.bf16.gmra.mrb[40].mxu0 %v957_v34  ;;  %2229 = vmatprep.subr.bf16.mxu1 %v2381_v17 }
 0x3ad   :  { %v931_v45 = vadd.f32 %v2726_v27, %v907_v32  ;;  %v908_v47 = vmax.f32 %v884_v40, 0.0  ;;  %2230 = vmatpush3.bf16.msra.mxu1 %v2381_v17 }
 0x3ae   :  { %v934_v51 = vadd.f32 %v2726_v27, %v910_v43  ;;  %2231 = vmatprep.subr.bf16.mxu1 %v2382_v55 }
 0x3af   :  { %v932_v52 = vadd.f32 %v2726_v27, %v908_v47  ;;  %v2386_v27 = vld [vmem:[#allocation2 + $0x158] sm:$0xff]  }
 0x3b0   :  { %v959_v53 = vpack.c.bf16 %v934_v51, %v933_v42  ;;  %2255 = vmatprep.subr.bf16.mxu0 %v2386_v27 }
 0x3b1   :  { %v958_v41 = vpack.c.bf16 %v932_v52, %v931_v45  ;;  %2232 = vmatpush3.bf16.msra.mxu1 %v2382_v55  ;;  %2256 = vmatpush3.bf16.msra.mxu0 %v2386_v27 }
 0x3b2   :  { %2257 = vmatprep.subr.bf16.mxu0 %v2387_v58 }
 0x3b3   :  { %2213 = vmatprep.mubr.bf16.mxu0 %v958_v41 }
 0x3b4   :  { %2214 = vmatmul.mubr.bf16.gmra.mrb[44].mxu0 %v959_v53 }
 0x3b5   :  { %2258 = vmatpush3.bf16.msra.mxu0 %v2387_v58 }
 0x46f   :  { %v2203_v61 = vpop.f32.mrb[32].mxu0 }
 0x470   :  { %v1059_v63 = vadd.f32 %v2203_v61, %v2760_v60  ;;  %v1050_v1 = vpop.f32.mrb[33].mxu0 }
 0x471   :  { %v1051_v4 = vadd.f32 %v2760_v60, %v1050_v1  ;;  %v2204_v59 = vpop.f32.mrb[34].mxu0 }
 0x472   :  { %v1115_v5 = vmax.f32 %v1059_v63, 0.0  ;;  %v1062_v8 = vadd.f32 %v2204_v59, %v2760_v60  ;;  %v1053_v12 = vpop.f32.mrb[35].mxu0 }
 0x473   :  { %v1113_v6 = vmax.f32 %v1051_v4, 0.0  ;;  %v1054_v14 = vadd.f32 %v2760_v60, %v1053_v12 }
 0x474   :  { %v1116_v15 = vmax.f32 %v1062_v8, 0.0  ;;  %v1139_v19 = vadd.f32 %v2767_v7, %v1115_v5 }
 0x475   :  { %v1137_v16 = vadd.f32 %v2767_v7, %v1113_v6  ;;  %v1114_v18 = vmax.f32 %v1054_v14, 0.0 }
 0x476   :  { %v1140_v20 = vadd.f32 %v2767_v7, %v1116_v15  ;;  %v2787_v36 = vadd.f32 %v1139_v19, %v2649_v13 }
 0x477   :  { %v1138_v21 = vadd.f32 %v2767_v7, %v1114_v18  ;;  %v2207_v22 = vpop.f32.mrb[36].mxu0  ;;  %v2780_v31 = vadd.f32 %v1137_v16, %v2643_v10 }
 0x478   :  { %v2776_v24 = vadd.f32 %v1140_v20, %v2640_v9  ;;  %v1075_v25 = vadd.f32 %v2207_v22, %v2760_v60  ;;  %v1066_v26 = vpop.f32.mrb[37].mxu0 }
 0x479   :  { %v2783_v34 = vadd.f32 %v1138_v21, %v2646_v11  ;;  %v1067_v35 = vadd.f32 %v2760_v60, %v1066_v26  ;;  %v2208_v23 = vpop.f32.mrb[38].mxu0 }
 0x47a   :  { %v1119_v37 = vmax.f32 %v1075_v25, 0.0  ;;  %v1078_v38 = vadd.f32 %v2208_v23, %v2760_v60  ;;  %v1069_v9 = vpop.f32.mrb[39].mxu0  ;;  %v1187_v11 = vpack.c.bf16 %v2776_v24, %v2787_v36 }
 0x47b   :  { %v1117_v39 = vmax.f32 %v1067_v35, 0.0  ;;  %v1070_v32 = vadd.f32 %v2760_v60, %v1069_v9  ;;  %v1186_v10 = vpack.c.bf16 %v2783_v34, %v2780_v31 }
 0x47c   :  { %v1120_v40 = vmax.f32 %v1078_v38, 0.0  ;;  %v1143_v13 = vadd.f32 %v2767_v7, %v1119_v37 }
 0x47d   :  { %v1141_v42 = vadd.f32 %v2767_v7, %v1117_v39  ;;  %v1118_v43 = vmax.f32 %v1070_v32, 0.0  ;;  %2233 = vmatprep.mubr.bf16.mxu1 %v1186_v10 }
 0x47e   :  { %v1144_v45 = vadd.f32 %v2767_v7, %v1120_v40  ;;  %2234 = vmatmul.mubr.bf16.vlgmr.msra.gmra.mrb[32].mxu1 %v1187_v11  ;;  %v2811_v57 = vadd.f32 %v1143_v13, %v2669_v33  ;;  %v2885_v13 = vld [vmem:[%s3025_s5 + $0x20] sm:$0xff]  }
 0x47f   :  { %v1142_v47 = vadd.f32 %v2767_v7, %v1118_v43  ;;  %v2211_v51 = vpop.f32.mrb[40].mxu0  ;;  %v2804_v54 = vadd.f32 %v1141_v42, %v2663_v29  ;;  %v2872_v42 = vld [vmem:[%s3025_s5 + $0x10] sm:$0xff]   ;;  %v2878_v43 = vld [vmem:[%s3025_s5 + $0x18] sm:$0xff]  }
 0x480   :  { %v2800_v52 = vadd.f32 %v1144_v45, %v2660_v28  ;;  %v1091_v53 = vadd.f32 %v2211_v51, %v2760_v60  ;;  %v1082_v41 = vpop.f32.mrb[41].mxu0  ;;  %v2893_v45 = vld [vmem:[%s3023_s3 + $0x5] ss:$0 sm:$0xff] }
 0x481   :  { %v2807_v17 = vadd.f32 %v1142_v47, %v2666_v30  ;;  %v1083_v55 = vadd.f32 %v2760_v60, %v1082_v41  ;;  %v2212_v56 = vpop.f32.mrb[42].mxu0 }
 0x482   :  { %v1123_v50 = vmax.f32 %v1091_v53, 0.0  ;;  %v1094_v27 = vadd.f32 %v2212_v56, %v2760_v60  ;;  %v1085_v28 = vpop.f32.mrb[43].mxu0  ;;  %v1189_v30 = vpack.c.bf16 %v2800_v52, %v2811_v57 }
 0x483   :  { %v1121_v58 = vmax.f32 %v1083_v55, 0.0  ;;  %v1086_v61 = vadd.f32 %v2760_v60, %v1085_v28  ;;  %v1188_v29 = vpack.c.bf16 %v2807_v17, %v2804_v54  ;;  %v2901_v28 = vld [vmem:[%s3024_s4 + $0x5] ss:$0 sm:$0xff] }
 0x484   :  { %v1124_v63 = vmax.f32 %v1094_v27, 0.0  ;;  %v1147_v33 = vadd.f32 %v2767_v7, %v1123_v50 }
 0x485   :  { %v1145_v1 = vadd.f32 %v2767_v7, %v1121_v58  ;;  %v1122_v4 = vmax.f32 %v1086_v61, 0.0  ;;  %2237 = vmatprep.mubr.bf16.mxu1 %v1188_v29 }
 0x486   :  { %v1148_v59 = vadd.f32 %v2767_v7, %v1124_v63  ;;  %2238 = vmatmul.mubr.bf16.gmra.mrb[36].mxu1 %v1189_v30  ;;  %v2835_v20 = vadd.f32 %v1147_v33, %v2680_v44 }
 0x487   :  { %v1146_v5 = vadd.f32 %v2767_v7, %v1122_v4  ;;  %v2215_v8 = vpop.f32.mrb[44].mxu0  ;;  %v2828_v15 = vadd.f32 %v1145_v1, %v2683_v46 }
 0x488   :  { %v2824_v12 = vadd.f32 %v1148_v59, %v2686_v48  ;;  %v1107_v6 = vadd.f32 %v2215_v8, %v2760_v60  ;;  %v1098_v14 = vpop.f32.mrb[45].mxu0 }
 0x489   :  { %v2831_v16 = vadd.f32 %v1146_v5, %v2689_v49  ;;  %v1099_v18 = vadd.f32 %v2760_v60, %v1098_v14  ;;  %v2216_v19 = vpop.f32.mrb[46].mxu0 }
 0x48a   :  { %v1127_v21 = vmax.f32 %v1107_v6, 0.0  ;;  %v1110_v22 = vadd.f32 %v2216_v19, %v2760_v60  ;;  %v1101_v48 = vpop.f32.mrb[47].mxu0  ;;  %v1191_v49 = vpack.c.bf16 %v2824_v12, %v2835_v20 }
 0x48b   :  { %v1125_v25 = vmax.f32 %v1099_v18, 0.0  ;;  %v1102_v26 = vadd.f32 %v2760_v60, %v1101_v48  ;;  %v1190_v46 = vpack.c.bf16 %v2831_v16, %v2828_v15 }
 0x48c   :  { %v1128_v35 = vmax.f32 %v1110_v22, 0.0  ;;  %v1151_v44 = vadd.f32 %v2767_v7, %v1127_v21 }
 0x48d   :  { %v1149_v23 = vadd.f32 %v2767_v7, %v1125_v25  ;;  %v1126_v37 = vmax.f32 %v1102_v26, 0.0  ;;  %2241 = vmatprep.mubr.bf16.mxu1 %v1190_v46 }
 0x48e   :  { %v1152_v38 = vadd.f32 %v2767_v7, %v1128_v35  ;;  %2242 = vmatmul.mubr.bf16.gmra.mrb[40].mxu1 %v1191_v49  ;;  %v2857_v10 = vadd.f32 %v1151_v44, %v2700_v62  ;;  %v2391_v62 = vld [vmem:[%s3025_s5] sm:$0xff]  }
 0x48f   :  { %v1150_v9 = vadd.f32 %v2767_v7, %v1126_v37  ;;  %v2851_v39 = vadd.f32 %v1149_v23, %v2703_v0  ;;  %v2388_v7 = vld [vmem:[#allocation2 + $0x168] sm:$0xff]   ;;  %v2390_v0 = vld [vmem:[#allocation2 + $0x178] sm:$0xff]   ;;  %2313 = vmatprep.subr.bf16.mxu1 %v2391_v62 }
 0x490   :  { %v2848_v60 = vadd.f32 %v1152_v38, %v2706_v2  ;;  %2259 = vmatprep.subr.bf16.mxu0 %v2388_v7  ;;  %v2389_v2 = vld [vmem:[#allocation2 + $0x170] sm:$0xff]   ;;  %2321 = vmatpush3.bf16.msra.mxu1 %v2391_v62 }
 0x491   :  { %v2854_v32 = vadd.f32 %v1150_v9, %v2709_v3  ;;  %2260 = vmatpush3.bf16.msra.mxu0 %v2388_v7  ;;  %v2392_v3 = vld [vmem:[%s3025_s5 + $0x8] sm:$0xff]  }
 0x492   :  { %v1193_v40 = vpack.c.bf16 %v2848_v60, %v2857_v10  ;;  %2261 = vmatprep.subr.bf16.mxu0 %v2389_v2  ;;  %2314 = vmatprep.subr.bf16.mxu1 %v2392_v3 }
 0x493   :  { %v1192_v11 = vpack.c.bf16 %v2854_v32, %v2851_v39 }
 0x494   :  { %2322 = vmatpush3.bf16.msra.mxu1 %v2392_v3 }
 0x495   :  { %2245 = vmatprep.mubr.bf16.mxu1 %v1192_v11  ;;  %2262 = vmatpush3.bf16.msra.mxu0 %v2389_v2 }
 0x496   :  { %2246 = vmatmul.mubr.bf16.gmra.mrb[44].mxu1 %v1193_v40  ;;  %2263 = vmatprep.subr.bf16.mxu0 %v2390_v0 }
 0x497   :  { %2315 = vmatprep.subr.bf16.mxu1 %v2872_v42 }
 0x498   :  { %2323 = vmatpush3.bf16.msra.mxu1 %v2872_v42 }
 0x499   :  { %2264 = vmatpush3.bf16.msra.mxu0 %v2390_v0  ;;  %2316 = vmatprep.subr.bf16.mxu1 %v2878_v43 }
 0x49a   :  { %2281 = vmatprep.subr.bf16.mxu0 %v2391_v62 }
 0x49c   :  { %2324 = vmatpush3.bf16.msra.mxu1 %v2878_v43 }
 0x49d   :  { %2317 = vmatprep.subr.bf16.mxu1 %v2885_v13 }
 0x4a0   :  { %2325 = vmatpush3.bf16.msra.mxu1 %v2885_v13 }
 0x551   :  { %v2235_v47 = vpop.f32.mrb[32].mxu1 }
 0x552   :  { %v1293_v51 = vadd.f32 %v2235_v47, %v2893_v45  ;;  %v1284_v53 = vpop.f32.mrb[33].mxu1 }
 0x553   :  { %v1285_v41 = vadd.f32 %v2893_v45, %v1284_v53  ;;  %v2236_v55 = vpop.f32.mrb[34].mxu1 }
 0x554   :  { %v1349_v56 = vmax.f32 %v1293_v51, 0.0  ;;  %v1296_v50 = vadd.f32 %v2236_v55, %v2893_v45  ;;  %v1287_v27 = vpop.f32.mrb[35].mxu1 }
 0x555   :  { %v1347_v58 = vmax.f32 %v1285_v41, 0.0  ;;  %v1288_v61 = vadd.f32 %v2893_v45, %v1287_v27 }
 0x556   :  { %v1350_v29 = vmax.f32 %v1296_v50, 0.0  ;;  %v1373_v30 = vadd.f32 %v2901_v28, %v1349_v56 }
 0x557   :  { %v1348_v63 = vmax.f32 %v1288_v61, 0.0  ;;  %v1371_v4 = vadd.f32 %v2901_v28, %v1347_v58 }
 0x558   :  { %v1374_v1 = vadd.f32 %v2901_v28, %v1350_v29 }
 0x559   :  { %v1372_v33 = vadd.f32 %v2901_v28, %v1348_v63  ;;  %v2239_v59 = vpop.f32.mrb[36].mxu1 }
 0x55a   :  { %v1405_v5 = vpack.c.bf16 %v1374_v1, %v1373_v30  ;;  %v1309_v8 = vadd.f32 %v2239_v59, %v2893_v45  ;;  %v1300_v6 = vpop.f32.mrb[37].mxu1 }
 0x55b   :  { %v1301_v14 = vadd.f32 %v2893_v45, %v1300_v6  ;;  %v2240_v18 = vpop.f32.mrb[38].mxu1  ;;  %v1404_v19 = vpack.c.bf16 %v1372_v33, %v1371_v4 }
 0x55c   :  { %v1353_v21 = vmax.f32 %v1309_v8, 0.0  ;;  %v1312_v22 = vadd.f32 %v2240_v18, %v2893_v45  ;;  %v1303_v48 = vpop.f32.mrb[39].mxu1 }
 0x55d   :  { %v1351_v25 = vmax.f32 %v1301_v14, 0.0  ;;  %v1304_v26 = vadd.f32 %v2893_v45, %v1303_v48  ;;  %2265 = vmatprep.mubr.bf16.mxu0 %v1404_v19 }
 0x55e   :  { %v1354_v46 = vmax.f32 %v1312_v22, 0.0  ;;  %2266 = vmatmul.mubr.bf16.vlgmr.msra.gmra.mrb[48].mxu0 %v1405_v5  ;;  %v1377_v49 = vadd.f32 %v2901_v28, %v1353_v21 }
 0x55f   :  { %v1352_v35 = vmax.f32 %v1304_v26, 0.0  ;;  %2282 = vmatpush3.bf16.msra.mxu0 %v2391_v62  ;;  %v1375_v37 = vadd.f32 %v2901_v28, %v1351_v25  ;;  %v2950_v26 = vld [vmem:[%s3023_s3 + $0x6] ss:$0 sm:$0xff] }
 0x560   :  { %v1378_v23 = vadd.f32 %v2901_v28, %v1354_v46  ;;  %2283 = vmatprep.subr.bf16.mxu0 %v2392_v3 }
 0x561   :  { %v1376_v44 = vadd.f32 %v2901_v28, %v1352_v35  ;;  %v2243_v38 = vpop.f32.mrb[40].mxu1 }
 0x562   :  { %v1325_v9 = vadd.f32 %v2243_v38, %v2893_v45  ;;  %v1316_v11 = vpop.f32.mrb[41].mxu1  ;;  %v1407_v40 = vpack.c.bf16 %v1378_v23, %v1377_v49  ;;  %v2956_v23 = vld [vmem:[%s3024_s4 + $0x6] ss:$0 sm:$0xff] }
 0x563   :  { %v1317_v7 = vadd.f32 %v2893_v45, %v1316_v11  ;;  %v2244_v2 = vpop.f32.mrb[42].mxu1  ;;  %v1406_v0 = vpack.c.bf16 %v1376_v44, %v1375_v37  ;;  %2284 = vmatpush3.bf16.msra.mxu0 %v2392_v3 }
 0x564   :  { %v1357_v62 = vmax.f32 %v1325_v9, 0.0  ;;  %v1328_v47 = vadd.f32 %v2244_v2, %v2893_v45  ;;  %v1319_v51 = vpop.f32.mrb[43].mxu1  ;;  %2285 = vmatprep.subr.bf16.mxu0 %v2872_v42 }
 0x565   :  { %v1355_v53 = vmax.f32 %v1317_v7, 0.0  ;;  %v1320_v41 = vadd.f32 %v2893_v45, %v1319_v51  ;;  %2269 = vmatprep.mubr.bf16.mxu0 %v1406_v0 }
 0x566   :  { %v1358_v55 = vmax.f32 %v1328_v47, 0.0  ;;  %2270 = vmatmul.mubr.bf16.gmra.mrb[52].mxu0 %v1407_v40  ;;  %v1381_v50 = vadd.f32 %v2901_v28, %v1357_v62 }
 0x567   :  { %v1356_v56 = vmax.f32 %v1320_v41, 0.0  ;;  %2286 = vmatpush3.bf16.msra.mxu0 %v2872_v42  ;;  %v1379_v3 = vadd.f32 %v2901_v28, %v1355_v53 }
 0x568   :  { %v1382_v27 = vadd.f32 %v2901_v28, %v1358_v55  ;;  %2287 = vmatprep.subr.bf16.mxu0 %v2878_v43 }
 0x569   :  { %v1380_v58 = vadd.f32 %v2901_v28, %v1356_v56  ;;  %v2247_v61 = vpop.f32.mrb[44].mxu1 }
 0x56a   :  { %v1341_v29 = vadd.f32 %v2247_v61, %v2893_v45  ;;  %v1332_v63 = vpop.f32.mrb[45].mxu1  ;;  %v1409_v30 = vpack.c.bf16 %v1382_v27, %v1381_v50 }
 0x56b   :  { %v1333_v1 = vadd.f32 %v2893_v45, %v1332_v63  ;;  %v2248_v4 = vpop.f32.mrb[46].mxu1  ;;  %v1408_v33 = vpack.c.bf16 %v1380_v58, %v1379_v3  ;;  %2288 = vmatpush3.bf16.msra.mxu0 %v2878_v43 }
 0x56c   :  { %v1361_v42 = vmax.f32 %v1341_v29, 0.0  ;;  %v1344_v59 = vadd.f32 %v2248_v4, %v2893_v45  ;;  %v1335_v5 = vpop.f32.mrb[47].mxu1  ;;  %2289 = vmatprep.subr.bf16.mxu0 %v2885_v13 }
 0x56d   :  { %v1359_v8 = vmax.f32 %v1333_v1, 0.0  ;;  %v1336_v6 = vadd.f32 %v2893_v45, %v1335_v5  ;;  %2273 = vmatprep.mubr.bf16.mxu0 %v1408_v33  ;;  %v2396_v45 = vld [vmem:[%s3025_s5 + $0x28] sm:$0xff]  }
 0x56e   :  { %v1362_v14 = vmax.f32 %v1344_v59, 0.0  ;;  %2274 = vmatmul.mubr.bf16.gmra.mrb[56].mxu0 %v1409_v30  ;;  %v1385_v19 = vadd.f32 %v2901_v28, %v1361_v42  ;;  %2318 = vmatprep.subr.bf16.mxu1 %v2396_v45 }
 0x56f   :  { %v1360_v18 = vmax.f32 %v1336_v6, 0.0  ;;  %2290 = vmatpush3.bf16.msra.mxu0 %v2885_v13  ;;  %v1383_v43 = vadd.f32 %v2901_v28, %v1359_v8  ;;  %2326 = vmatpush3.bf16.msra.mxu1 %v2396_v45  ;;  %v2397_v13 = vld [vmem:[%s3025_s5 + $0x30] sm:$0xff]  }
 0x570   :  { %v1386_v21 = vadd.f32 %v2901_v28, %v1362_v14  ;;  %2291 = vmatprep.subr.bf16.mxu0 %v2396_v45  ;;  %2319 = vmatprep.subr.bf16.mxu1 %v2397_v13 }
 0x571   :  { %v1384_v22 = vadd.f32 %v2901_v28, %v1360_v18  ;;  %v2398_v28 = vld [vmem:[%s3025_s5 + $0x38] sm:$0xff]   ;;  %s2450_s5 = smov [#allocation5]  }
 0x572   :  { %v1411_v48 = vpack.c.bf16 %v1386_v21, %v1385_v19 }
 0x573   :  { %v1410_v25 = vpack.c.bf16 %v1384_v22, %v1383_v43  ;;  %2292 = vmatpush3.bf16.msra.mxu0 %v2396_v45  ;;  %2327 = vmatpush3.bf16.msra.mxu1 %v2397_v13 }
 0x574   :  { %2293 = vmatprep.subr.bf16.mxu0 %v2397_v13  ;;  %2320 = vmatprep.subr.bf16.mxu1 %v2398_v28 }
 0x575   :  { %2277 = vmatprep.mubr.bf16.mxu0 %v1410_v25 }
 0x576   :  { %2278 = vmatmul.mubr.bf16.gmra.mrb[60].mxu0 %v1411_v48 }
 0x577   :  { %2294 = vmatpush3.bf16.msra.mxu0 %v2397_v13  ;;  %2328 = vmatpush3.bf16.msra.mxu1 %v2398_v28 }
 0x578   :  { %2295 = vmatprep.subr.bf16.mxu0 %v2398_v28 }
 0x57b   :  { %2296 = vmatpush3.bf16.msra.mxu0 %v2398_v28 }
 0x631   :  { %v2267_v46 = vpop.f32.mrb[48].mxu0 }
 0x632   :  { %v1511_v35 = vadd.f32 %v2267_v46, %v2950_v26  ;;  %v1502_v49 = vpop.f32.mrb[49].mxu0 }
 0x633   :  { %v1503_v37 = vadd.f32 %v2950_v26, %v1502_v49  ;;  %v2268_v44 = vpop.f32.mrb[50].mxu0 }
 0x634   :  { %v1567_v38 = vmax.f32 %v1511_v35, 0.0  ;;  %v1514_v9 = vadd.f32 %v2268_v44, %v2950_v26  ;;  %v1505_v11 = vpop.f32.mrb[51].mxu0 }
 0x635   :  { %v1565_v40 = vmax.f32 %v1503_v37, 0.0  ;;  %v1506_v7 = vadd.f32 %v2950_v26, %v1505_v11 }
 0x636   :  { %v1591_v2 = vadd.f32 %v2956_v23, %v1567_v38  ;;  %v1568_v0 = vmax.f32 %v1514_v9, 0.0 }
 0x637   :  { %v1589_v62 = vadd.f32 %v2956_v23, %v1565_v40  ;;  %v1566_v47 = vmax.f32 %v1506_v7, 0.0 }
 0x638   :  { %v1592_v51 = vadd.f32 %v2956_v23, %v1568_v0  ;;  %v1607_v55 = vadd.f32 %v1591_v2, %v2787_v36 }
 0x639   :  { %v1590_v53 = vadd.f32 %v2956_v23, %v1566_v47  ;;  %v2271_v41 = vpop.f32.mrb[52].mxu0  ;;  %v1605_v3 = vadd.f32 %v1589_v62, %v2780_v31 }
 0x63a   :  { %v1608_v56 = vadd.f32 %v1592_v51, %v2776_v24  ;;  %v1527_v50 = vadd.f32 %v2271_v41, %v2950_v26  ;;  %v1518_v27 = vpop.f32.mrb[53].mxu0 }
 0x63b   :  { %v1606_v58 = vadd.f32 %v1590_v53, %v2783_v34  ;;  %v1519_v61 = vadd.f32 %v2950_v26, %v1518_v27  ;;  %v2272_v29 = vpop.f32.mrb[54].mxu0 }
 0x63c   :  { %v1622_v63 = vpack.c.bf16 %v1608_v56, %v1607_v55  ;;  %v1571_v30 = vmax.f32 %v1527_v50, 0.0  ;;  %v1530_v1 = vadd.f32 %v2272_v29, %v2950_v26  ;;  %v1521_v4 = vpop.f32.mrb[55].mxu0 }
 0x63d   :  { %v1569_v33 = vmax.f32 %v1519_v61, 0.0  ;;  %v1522_v36 = vadd.f32 %v2950_v26, %v1521_v4  ;;  %v1621_v42 = vpack.c.bf16 %v1606_v58, %v1605_v3 }
 0x63e   :  { %v1595_v24 = vadd.f32 %v2956_v23, %v1571_v30  ;;  %v1572_v59 = vmax.f32 %v1530_v1, 0.0 }
 0x63f   :  { %v1593_v5 = vadd.f32 %v2956_v23, %v1569_v33  ;;  %v1570_v31 = vmax.f32 %v1522_v36, 0.0  ;;  %2297 = vmatprep.mubr.bf16.mxu0 %v1621_v42  ;;  %v1938_v33 = vld [vmem:[%s3026_s6] ss:$0 sm:$0xff]  ;;  %s1837_s6 = sshll.u32 %s2450_s5, 4  ;;  %s1838_s6 = int_to_ptr.vmem [resolvable:$true] %s1837_s6 }
 0x640   :  { %v1596_v34 = vadd.f32 %v2956_v23, %v1572_v59  ;;  %2298 = vmatmul.mubr.bf16.vlgmr.msra.gmra.mrb[64].mxu0 %v1622_v63  ;;  %v1611_v14 = vadd.f32 %v1595_v24, %v2811_v57  ;;  %s2421_s25 = scalar_lea.vmem %s1838_s6, 16  ;;  %s2425_s26 = scalar_lea.vmem %s1838_s6, 32 }
 0x641   :  { %v1594_v8 = vadd.f32 %v2956_v23, %v1570_v31  ;;  %v2275_v6 = vpop.f32.mrb[56].mxu0  ;;  %v1609_v43 = vadd.f32 %v1593_v5, %v2804_v54  ;;  %p2422_p8 = scmp.ne.s32.totalorder %s1838_s6, %s2421_s25  ;;  %p2426_p9 = scmp.lt.s32.totalorder %s1838_s6, %s1838_s6 }
 0x642   :  { %v1612_v18 = vadd.f32 %v1596_v34, %v2800_v52  ;;  %v1543_v19 = vadd.f32 %v2275_v6, %v2950_v26  ;;  %v1534_v21 = vpop.f32.mrb[57].mxu0  ;;  %p2427_p10 = scmp.lt.s32.totalorder %s2425_s26, %s2421_s25 }
 0x643   :  { %v1610_v22 = vadd.f32 %v1594_v8, %v2807_v17  ;;  %v1535_v48 = vadd.f32 %v2950_v26, %v1534_v21  ;;  %v2276_v25 = vpop.f32.mrb[58].mxu0 }
 0x644   :  { %v1624_v45 = vpack.c.bf16 %v1612_v18, %v1611_v14  ;;  %v1575_v13 = vmax.f32 %v1543_v19, 0.0  ;;  %v1546_v28 = vadd.f32 %v2276_v25, %v2950_v26  ;;  %v1537_v46 = vpop.f32.mrb[59].mxu0  ;;  %p2428_p11 = por %p2427_p10, %p2426_p9 }
 0x645   :  { %v1573_v35 = vmax.f32 %v1535_v48, 0.0  ;;  %v1538_v57 = vadd.f32 %v2950_v26, %v1537_v46  ;;  %v1623_v49 = vpack.c.bf16 %v1610_v22, %v1609_v43 }
 0x646   :  { %v1599_v52 = vadd.f32 %v2956_v23, %v1575_v13  ;;  %v1576_v37 = vmax.f32 %v1546_v28, 0.0  ;;  %p2429_p12 = pnand %p2428_p11, %p2422_p8 }
 0x647   :  { %v1597_v44 = vadd.f32 %v2956_v23, %v1573_v35  ;;  %v1574_v54 = vmax.f32 %v1538_v57, 0.0  ;;  %2301 = vmatprep.mubr.bf16.mxu1 %v1623_v49 }
 0x648   :  { %v1600_v17 = vadd.f32 %v2956_v23, %v1576_v37  ;;  %2302 = vmatmul.mubr.bf16.vlgmr.msra.gmra.mrb[48].mxu1 %v1624_v45  ;;  %v1615_v11 = vadd.f32 %v1599_v52, %v2835_v20 }
 0x649   :  { %v1598_v38 = vadd.f32 %v2956_v23, %v1574_v54  ;;  %v2279_v9 = vpop.f32.mrb[60].mxu0  ;;  %v1613_v0 = vadd.f32 %v1597_v44, %v2828_v15 }
 0x64a   :  { %v1616_v40 = vadd.f32 %v1600_v17, %v2824_v12  ;;  %v1559_v7 = vadd.f32 %v2279_v9, %v2950_v26  ;;  %v1550_v2 = vpop.f32.mrb[61].mxu0 }
 0x64b   :  { %v1614_v62 = vadd.f32 %v1598_v38, %v2831_v16  ;;  %v1551_v47 = vadd.f32 %v2950_v26, %v1550_v2  ;;  %v2280_v51 = vpop.f32.mrb[62].mxu0 }
 0x64c   :  { %v1579_v53 = vmax.f32 %v1559_v7, 0.0  ;;  %v1562_v41 = vadd.f32 %v2280_v51, %v2950_v26  ;;  %v1553_v55 = vpop.f32.mrb[63].mxu0  ;;  %v1626_v56 = vpack.c.bf16 %v1616_v40, %v1615_v11 }
 0x64d   :  { %v1577_v50 = vmax.f32 %v1551_v47, 0.0  ;;  %v1554_v20 = vadd.f32 %v2950_v26, %v1553_v55  ;;  %v1625_v27 = vpack.c.bf16 %v1614_v62, %v1613_v0 }
 0x64e   :  { %v1603_v12 = vadd.f32 %v2956_v23, %v1579_v53  ;;  %v1580_v3 = vmax.f32 %v1562_v41, 0.0 }
 0x64f   :  { %v1601_v58 = vadd.f32 %v2956_v23, %v1577_v50  ;;  %v1578_v15 = vmax.f32 %v1554_v20, 0.0  ;;  %2305 = vmatprep.mubr.bf16.mxu1 %v1625_v27 }
 0x650   :  { %v1604_v16 = vadd.f32 %v2956_v23, %v1580_v3  ;;  %2306 = vmatmul.mubr.bf16.gmra.mrb[52].mxu1 %v1626_v56  ;;  %v1619_v29 = vadd.f32 %v1603_v12, %v2857_v10 }
 0x651   :  { %v1602_v61 = vadd.f32 %v2956_v23, %v1578_v15  ;;  %v1617_v30 = vadd.f32 %v1601_v58, %v2851_v39 }
 0x652   :  { %v1620_v63 = vadd.f32 %v1604_v16, %v2848_v60 }
 0x653   :  { %v1618_v26 = vadd.f32 %v1602_v61, %v2854_v32 }
 0x654   :  { %v1628_v1 = vpack.c.bf16 %v1620_v63, %v1619_v29 }
 0x655   :  { %v1627_v4 = vpack.c.bf16 %v1618_v26, %v1617_v30 }
 0x657   :  { %2309 = vmatprep.mubr.bf16.mxu1 %v1627_v4 }
 0x658   :  { %2310 = vmatmul.mubr.bf16.gmra.mrb[56].mxu1 %v1628_v1 }
 0x713   :  { %v2299_v36 = vpop.f32.mrb[64].mxu0 }
 0x714   :  { %v1734_v42 = vpop.f32.mrb[65].mxu0  ;;  %v1743_v5 = vadd.f32 %v2299_v36, %v1938_v33 }
 0x715   :  { %v2300_v24 = vpop.f32.mrb[66].mxu0  ;;  %v1735_v23 = vadd.f32 %v1938_v33, %v1734_v42 }
 0x716   :  { %v1737_v59 = vpop.f32.mrb[67].mxu0  ;;  %v1746_v34 = vadd.f32 %v2300_v24, %v1938_v33 }
 0x717   :  { %1797 = vxpose.xlu0.b32.start [1/16] (narrow) %v1735_v23, 8  ;;  %v1738_v10 = vadd.f32 %v1938_v33, %v1737_v59 }
 0x71b   :  { %v2303_v60 = vpop.f32.mrb[48].mxu1  ;;  %1798 = vxpose.xlu0.b32.cont [2/16] (narrow) %v1738_v10, 8 }
 0x71c   :  { %v1750_v39 = vpop.f32.mrb[49].mxu1  ;;  %v1759_v48 = vadd.f32 %v2303_v60, %v1938_v33 }
 0x71d   :  { %v2304_v32 = vpop.f32.mrb[50].mxu1  ;;  %v1751_v14 = vadd.f32 %v1938_v33, %v1750_v39 }
 0x71e   :  { %v1753_v31 = vpop.f32.mrb[51].mxu1  ;;  %v1762_v13 = vadd.f32 %v2304_v32, %v1938_v33 }
 0x71f   :  { %1799 = vxpose.xlu0.b32.cont [3/16] (narrow) %v1743_v5, 8  ;;  %v1754_v21 = vadd.f32 %v1938_v33, %v1753_v31 }
 0x723   :  { %v2307_v8 = vpop.f32.mrb[52].mxu1  ;;  %1800 = vxpose.xlu0.b32.cont [4/16] (narrow) %v1746_v34, 8 }
 0x724   :  { %v1766_v6 = vpop.f32.mrb[53].mxu1  ;;  %v1775_v35 = vadd.f32 %v2307_v8, %v1938_v33 }
 0x725   :  { %v2308_v18 = vpop.f32.mrb[54].mxu1  ;;  %v1767_v28 = vadd.f32 %v1938_v33, %v1766_v6 }
 0x726   :  { %v1769_v19 = vpop.f32.mrb[55].mxu1  ;;  %v1778_v57 = vadd.f32 %v2308_v18, %v1938_v33 }
 0x727   :  { %1801 = vxpose.xlu0.b32.cont [5/16] (narrow) %v1751_v14, 8  ;;  %v1770_v46 = vadd.f32 %v1938_v33, %v1769_v19 }
 0x72b   :  { %v2311_v43 = vpop.f32.mrb[56].mxu1  ;;  %1802 = vxpose.xlu0.b32.cont [6/16] (narrow) %v1754_v21, 8 }
 0x72c   :  { %v1782_v22 = vpop.f32.mrb[57].mxu1  ;;  %v1791_v37 = vadd.f32 %v2311_v43, %v1938_v33 }
 0x72d   :  { %v2312_v25 = vpop.f32.mrb[58].mxu1  ;;  %v1783_v49 = vadd.f32 %v1938_v33, %v1782_v22 }
 0x72e   :  { %v1785_v45 = vpop.f32.mrb[59].mxu1  ;;  %v1794_v44 = vadd.f32 %v2312_v25, %v1938_v33 }
 0x72f   :  { %1803 = vxpose.xlu0.b32.cont [7/16] (narrow) %v1759_v48, 8  ;;  %v1786_v52 = vadd.f32 %v1938_v33, %v1785_v45 }
 0x733   :  { %1804 = vxpose.xlu0.b32.cont [8/16] (narrow) %v1762_v13, 8 }
 0x737   :  { %1805 = vxpose.xlu0.b32.cont [9/16] (narrow) %v1767_v28, 8 }
 0x73b   :  { %1806 = vxpose.xlu0.b32.cont [10/16] (narrow) %v1770_v46, 8 }
 0x73f   :  { %1807 = vxpose.xlu0.b32.cont [11/16] (narrow) %v1775_v35, 8 }
 0x743   :  { %1808 = vxpose.xlu0.b32.cont [12/16] (narrow) %v1778_v57, 8 }
 0x747   :  { %1809 = vxpose.xlu0.b32.cont [13/16] (narrow) %v1783_v49, 8 }
 0x74b   :  { %1810 = vxpose.xlu0.b32.cont [14/16] (narrow) %v1786_v52, 8 }
 0x74f   :  { %1811 = vxpose.xlu0.b32.cont [15/16] (narrow) %v1791_v37, 8 }
 0x753   :  { %1812 = vxpose.xlu0.b32.end [16/16] (narrow) %v1794_v44, 8 }
 0x797   :  { %v1813_v54 = vpop.trf.xlu0 }
 0x798   :  { %v1829_v17 = vmul.f32 10.0, %v1813_v54 }
 0x79a   :  { %1830 = vst [vmem:[#allocation5] sm:$0x1] %v1829_v17 }
 0x79b   :  { %2432 = shalt.err (!%p2429_p12)
}
 0x79c   :  { %s2433_s29 = scalar_lea.hbm %s3027_s7, 16 }
 0x79d   :  { %p2434_p13 = scmp.ne.s32.totalorder %s3027_s7, %s2433_s29  ;;  %p2437_p0 = scmp.lt.u32.totalorder %s2433_s29, %s3027_s7 }
 0x79f   :  { %p2439_p1 = pnand %p2437_p0, %p2434_p13 }
 0x7a1   :  { %2442 = shalt.err (!%p2439_p1)
}
 0x7a2   :  { %1840 = dma.vmem_to_hbm [thread:$0]  %s1838_s6, 16, %s3027_s7, [#allocation4]  }
 0x7a3   :  { %2445 = dma.done.wait [#allocation4], 16  }
 0x7a4   :  { %2446 = vsyncadd [#allocation4], 4294967280 }
 0x7a5   :  { %1844 = vsyncpa [#allocation3], 1 }
 0x7a6   :  { %1845 = vsyncpa [#allocation4], 1 }

</bundles_post_ra>
